<compile_context>
chip_gen: v7x
topology: tpu7x:2x2x1
jax: 0.10.0
libtpu: 0.0.40
codegen_flags: <defaults>
</compile_context>

<pallas_src>
from functools import partial

import jax
import jax.numpy as jnp
from jax import lax
from jax.experimental import pallas as pl
from jax.experimental.pallas import tpu as pltpu


def _round_up(n: int, m: int) -> int:
    return ((n + m - 1) // m) * m


# ---------------------------------------------------------------------------
# Fused encoder kernel: all layers / directions, single grid step.
# ---------------------------------------------------------------------------
def _build_encoder_kernel(T, Bp, H, num_layers, num_dirs):
    n_w = 3 * num_layers * num_dirs   # (W_ih^T, W_hh^T, bias) per layer/dir

    def kernel(*refs):
        x_ref = refs[0]                       # (T*Bp, D0)
        w_refs = refs[1:1 + n_w]
        hc_ref = refs[1 + n_w]                # (2*L*dirs, Bp, H)
        y_refs = refs[2 + n_w:]               # (L-1) VMEM scratch buffers

        inp2d = x_ref[...].astype(jnp.float32)   # layer-0 input, (T*Bp, D0)

        for layer in range(num_layers):
            y_scr = y_refs[layer] if layer < num_layers - 1 else None

            for d in range(num_dirs):
                p = 3 * (layer * num_dirs + d)
                wih = w_refs[p][...]          # (Din, 4H), resident in VMEM
                whh = w_refs[p + 1][...]      # (H, 4H)
                bias = w_refs[p + 2][...]     # (1, 4H)

                # Hoisted input projection: one MXU matmul over all T steps.
                xproj = jnp.dot(inp2d, wih,
                                preferred_element_type=jnp.float32) + bias

                h = jnp.zeros((Bp, H), jnp.float32)
                c = jnp.zeros((Bp, H), jnp.float32)

                # Fully unrolled time loop; h/c stay in vregs.
                for t in range(T):
                    tt = (T - 1 - t) if d == 1 else t
                    g = (xproj[tt * Bp:(tt + 1) * Bp, :]
                         + jnp.dot(h, whh,
                                   preferred_element_type=jnp.float32))
                    # one sigmoid over the whole (Bp, 4H) tile (EUP pass)
                    sg = 1.0 / (1.0 + jnp.exp(-g))
                    i_g = sg[:, 0 * H:1 * H]
                    f_g = sg[:, 1 * H:2 * H]
                    o_g = sg[:, 3 * H:4 * H]
                    g_g = jnp.tanh(g[:, 2 * H:3 * H])
                    c = f_g * c + i_g * g_g
                    h = o_g * jnp.tanh(c)
                    if y_scr is not None:
                        # intermediate y stays in VMEM (never goes to HBM)
                        y_scr[tt * Bp:(tt + 1) * Bp, d * H:(d + 1) * H] = h

                idx = layer * num_dirs + d
                hc_ref[idx] = h.astype(hc_ref.dtype)
                hc_ref[num_layers * num_dirs + idx] = c.astype(hc_ref.dtype)

            if layer < num_layers - 1:
                inp2d = y_scr[...]            # (T*Bp, dirs*H) next-layer input

    return kernel


# ---------------------------------------------------------------------------
# Host wrapper: single pallas_call for the whole encoder.
# ---------------------------------------------------------------------------
@partial(jax.jit, static_argnames=("hidden_size", "num_layers", "num_directions"))
def lstm_encoder_forward(x, kernel_params, *, hidden_size, num_layers,
                         num_directions):
    B, T, D0 = x.shape
    H = hidden_size
    Bp = _round_up(B, 8)                      # sublane alignment only

    # One tiny fused copy: pad batch -> time-major -> flatten to (T*Bp, D0).
    x_p = jnp.pad(x, ((0, Bp - B), (0, 0), (0, 0)))
    x2d = jnp.transpose(x_p, (1, 0, 2)).reshape(T * Bp, D0)

    flat_in = [x2d]
    in_specs = [pl.BlockSpec((T * Bp, D0), lambda i: (0, 0))]
    for (wih_t, whh_t, bias) in kernel_params:
        d_in = wih_t.shape[0]
        flat_in += [wih_t, whh_t, bias]
        in_specs += [
            pl.BlockSpec((d_in, 4 * H), lambda i: (0, 0)),   # W_ih^T resident
            pl.BlockSpec((H, 4 * H), lambda i: (0, 0)),      # W_hh^T resident
            pl.BlockSpec((1, 4 * H), lambda i: (0, 0)),      # fused bias
        ]

    n_state = num_layers * num_directions
    out_shape = jax.ShapeDtypeStruct((2 * n_state, Bp, H), x.dtype)
    out_specs = pl.BlockSpec((2 * n_state, Bp, H), lambda i: (0, 0, 0))
    scratch_shapes = [pltpu.VMEM((T * Bp, num_directions * H), jnp.float32)
                      for _ in range(num_layers - 1)]

    kernel = _build_encoder_kernel(T, Bp, H, num_layers, num_directions)

    hc = pl.pallas_call(
        kernel,
        out_shape=out_shape,
        grid_spec=pltpu.PrefetchScalarGridSpec(
            num_scalar_prefetch=0,
            grid=(1,),
            in_specs=in_specs,
            out_specs=out_specs,
            scratch_shapes=scratch_shapes,
        ),
        compiler_params=pltpu.CompilerParams(
            dimension_semantics=("arbitrary",),
        ),
    )(*flat_in)

    return hc[:, :B, :]                       # drop padded batch rows


# ---------------------------------------------------------------------------
# LSTMEncoder (JAX/Pallas counterpart of the PyTorch module).
# ---------------------------------------------------------------------------
class LSTMEncoderPallas:
    def __init__(self, input_size, hidden_size, num_layers, bidirectional=False,
                 *, key):
        self.input_size = input_size
        self.hidden_size = hidden_size
        self.num_layers = num_layers
        self.bidirectional = bidirectional
        self.num_directions = 2 if bidirectional else 1

        bound = 1.0 / (hidden_size ** 0.5)
        kparams = []
        for layer in range(num_layers):
            layer_in = input_size if layer == 0 else hidden_size * self.num_directions
            for _ in range(self.num_directions):
                key, k1, k2, k3, k4 = jax.random.split(key, 5)
                w_ih = jax.random.uniform(k1, (4 * hidden_size, layer_in),
                                          jnp.float32, -bound, bound)
                w_hh = jax.random.uniform(k2, (4 * hidden_size, hidden_size),
                                          jnp.float32, -bound, bound)
                b_ih = jax.random.uniform(k3, (4 * hidden_size,),
                                          jnp.float32, -bound, bound)
                b_hh = jax.random.uniform(k4, (4 * hidden_size,),
                                          jnp.float32, -bound, bound)
                # store kernel-ready forms: W^T and fused bias
                kparams.append((jnp.transpose(w_ih),
                                jnp.transpose(w_hh),
                                (b_ih + b_hh).reshape(1, 4 * hidden_size)))
        self.kernel_params = tuple(kparams)
        # TODO(synk): inter-layer dropout(0.5) of nn.LSTM (train mode) omitted.

    # ---- Pallas path -------------------------------------------------------
    def forward(self, x):
        return lstm_encoder_forward(
            x, self.kernel_params,
            hidden_size=self.hidden_size,
            num_layers=self.num_layers,
            num_directions=self.num_directions)

    def __call__(self, x):
        return self.forward(x)

    # ---- Pure-JAX reference (lax.scan) for correctness checking ------------
    def _ref_layer(self, x_tm, wih_t, whh_t, bias):
        H = self.hidden_size

        def step(carry, x_t):
            h, c = carry
            g = x_t @ wih_t + h @ whh_t + bias
            sg = 1.0 / (1.0 + jnp.exp(-g))
            i_g = sg[:, 0 * H:1 * H]
            f_g = sg[:, 1 * H:2 * H]
            o_g = sg[:, 3 * H:4 * H]
            g_g = jnp.tanh(g[:, 2 * H:3 * H])
            c_new = f_g * c + i_g * g_g
            h_new = o_g * jnp.tanh(c_new)
            return (h_new, c_new), h_new

        B = x_tm.shape[1]
        init = (jnp.zeros((B, H), jnp.float32), jnp.zeros((B, H), jnp.float32))
        (h, c), ys = lax.scan(step, init, x_tm)
        return ys, h, c

    def forward_ref(self, x):
        xs = jnp.transpose(x, (1, 0, 2))      # (T, B, D)
        h_list, c_list = [], []
        layer_in = xs
        for layer in range(self.num_layers):
            outs = []
            for d in range(self.num_directions):
                wih_t, whh_t, bias = self.kernel_params[
                    layer * self.num_directions + d]
                inp = layer_in if d == 0 else jnp.flip(layer_in, axis=0)
                y, h, c = self._ref_layer(inp, wih_t, whh_t, bias)
                if d == 1:
                    y = jnp.flip(y, axis=0)
                outs.append(y)
                h_list.append(h)
                c_list.append(c)
            layer_in = outs[0] if self.num_directions == 1 else jnp.concatenate(
                outs, axis=-1)
        h_n = jnp.stack(h_list, axis=0)
        c_n = jnp.stack(c_list, axis=0)
        return jnp.concatenate([h_n, c_n], axis=0)


# ---------------------------------------------------------------------------
# Driver
# ---------------------------------------------------------------------------
if __name__ == "__main__":
    key = jax.random.PRNGKey(0)
    k_param, k_x = jax.random.split(key)

    batch, seq_len, input_size, hidden_size, num_layers = 2, 8, 16, 32, 2

    model = LSTMEncoderPallas(input_size, hidden_size, num_layers,
                              bidirectional=False, key=k_param)
    x = jax.random.normal(k_x, (batch, seq_len, input_size), dtype=jnp.float32)

    out = jax.block_until_ready(model(x))

    # Expected shape: (2 * num_layers * num_directions, B, H)
    assert out.shape == (2 * num_layers * 1, batch, hidden_size), out.shape
    assert out.dtype == jnp.float32

    # Correctness vs pure-JAX lax.scan reference.
    ref = jax.block_until_ready(model.forward_ref(x))
    assert bool(jnp.allclose(out, ref, atol=1e-3, rtol=1e-3)), (
        float(jnp.max(jnp.abs(out - ref))))

    print("KERNEL_OK")
</pallas_src>

<mosaic_0001>
module attributes {stable_mosaic.version = 11 : i64} {
  func.func @kernel(%arg0: i32, %arg1: memref<64x16xf32, #tpu.memory_space<vmem>>, %arg2: memref<16x128xf32, #tpu.memory_space<vmem>>, %arg3: memref<32x128xf32, #tpu.memory_space<vmem>>, %arg4: memref<1x128xf32, #tpu.memory_space<vmem>>, %arg5: memref<32x128xf32, #tpu.memory_space<vmem>>, %arg6: memref<32x128xf32, #tpu.memory_space<vmem>>, %arg7: memref<1x128xf32, #tpu.memory_space<vmem>>, %arg8: memref<4x8x32xf32, #tpu.memory_space<vmem>>, %arg9: memref<64x32xf32, #tpu.memory_space<vmem>>) attributes {dimension_semantics = [#tpu.dimension_semantics<arbitrary>], iteration_bounds = array<i64: 1>, scalar_prefetch = 0 : i64, scratch_operands = 1 : i64, tpu.core_type = #tpu.core_type<tc>, window_params = [{pipeline_mode = #tpu.pipeline_mode<synchronous>, transform_indices = @transform_0, window_bounds = array<i64: 64, 16>}, {pipeline_mode = #tpu.pipeline_mode<synchronous>, transform_indices = @transform_1, window_bounds = array<i64: 16, 128>}, {pipeline_mode = #tpu.pipeline_mode<synchronous>, transform_indices = @transform_2, window_bounds = array<i64: 32, 128>}, {pipeline_mode = #tpu.pipeline_mode<synchronous>, transform_indices = @transform_3, window_bounds = array<i64: 1, 128>}, {pipeline_mode = #tpu.pipeline_mode<synchronous>, transform_indices = @transform_4, window_bounds = array<i64: 32, 128>}, {pipeline_mode = #tpu.pipeline_mode<synchronous>, transform_indices = @transform_5, window_bounds = array<i64: 32, 128>}, {pipeline_mode = #tpu.pipeline_mode<synchronous>, transform_indices = @transform_6, window_bounds = array<i64: 1, 128>}, {pipeline_mode = #tpu.pipeline_mode<synchronous>, transform_indices = @transform_7, window_bounds = array<i64: 4, 8, 32>}]} {
    %c0 = arith.constant 0 : index
    %c0_0 = arith.constant 0 : index
    %0 = vector.load %arg1[%c0, %c0_0] : memref<64x16xf32, #tpu.memory_space<vmem>>, vector<64x16xf32>
    %c0_1 = arith.constant 0 : index
    %c0_2 = arith.constant 0 : index
    %1 = vector.load %arg2[%c0_1, %c0_2] : memref<16x128xf32, #tpu.memory_space<vmem>>, vector<16x128xf32>
    %c0_3 = arith.constant 0 : index
    %c0_4 = arith.constant 0 : index
    %2 = vector.load %arg3[%c0_3, %c0_4] : memref<32x128xf32, #tpu.memory_space<vmem>>, vector<32x128xf32>
    %c0_5 = arith.constant 0 : index
    %c0_6 = arith.constant 0 : index
    %3 = vector.load %arg4[%c0_5, %c0_6] : memref<1x128xf32, #tpu.memory_space<vmem>>, vector<1x128xf32>
    %cst = arith.constant dense<0.000000e+00> : vector<64x128xf32>
    %4 = tpu.matmul %0, %1, %cst {dimension_numbers = #tpu.dot_dimension_numbers<[1], [0], [0], [1], [0, 0, 1, 1], [], []>} : vector<64x16xf32>, vector<16x128xf32>, vector<64x128xf32> -> vector<64x128xf32>
    %5 = vector.broadcast %3 : vector<1x128xf32> to vector<64x128xf32>
    %6 = arith.addf %4, %5 : vector<64x128xf32>
    %cst_7 = arith.constant 0.000000e+00 : f32
    %7 = vector.broadcast %cst_7 : f32 to vector<8x32xf32>
    %cst_8 = arith.constant 0.000000e+00 : f32
    %8 = vector.broadcast %cst_8 : f32 to vector<8x32xf32>
    %9 = vector.extract_strided_slice %6 {offsets = [0, 0], sizes = [8, 128], strides = [1, 1]} : vector<64x128xf32> to vector<8x128xf32>
    %cst_9 = arith.constant dense<0.000000e+00> : vector<8x128xf32>
    %10 = tpu.matmul %7, %2, %cst_9 {dimension_numbers = #tpu.dot_dimension_numbers<[1], [0], [0], [1], [0, 0, 1, 1], [], []>} : vector<8x32xf32>, vector<32x128xf32>, vector<8x128xf32> -> vector<8x128xf32>
    %11 = arith.addf %9, %10 : vector<8x128xf32>
    %cst_10 = arith.constant 0.000000e+00 : f32
    %12 = vector.broadcast %cst_10 : f32 to vector<8x128xf32>
    %13 = arith.subf %12, %11 : vector<8x128xf32>
    %14 = math.exp %13 : vector<8x128xf32>
    %cst_11 = arith.constant 1.000000e+00 : f32
    %15 = vector.broadcast %cst_11 : f32 to vector<8x128xf32>
    %16 = arith.addf %15, %14 : vector<8x128xf32>
    %cst_12 = arith.constant 1.000000e+00 : f32
    %17 = vector.broadcast %cst_12 : f32 to vector<8x128xf32>
    %18 = arith.divf %17, %16 : vector<8x128xf32>
    %19 = vector.extract_strided_slice %18 {offsets = [0, 0], sizes = [8, 32], strides = [1, 1]} : vector<8x128xf32> to vector<8x32xf32>
    %20 = vector.extract_strided_slice %18 {offsets = [0, 32], sizes = [8, 32], strides = [1, 1]} : vector<8x128xf32> to vector<8x32xf32>
    %21 = vector.extract_strided_slice %18 {offsets = [0, 96], sizes = [8, 32], strides = [1, 1]} : vector<8x128xf32> to vector<8x32xf32>
    %22 = vector.extract_strided_slice %11 {offsets = [0, 64], sizes = [8, 32], strides = [1, 1]} : vector<8x128xf32> to vector<8x32xf32>
    %23 = math.tanh %22 : vector<8x32xf32>
    %24 = arith.mulf %20, %8 : vector<8x32xf32>
    %25 = arith.mulf %19, %23 : vector<8x32xf32>
    %26 = arith.addf %24, %25 : vector<8x32xf32>
    %27 = math.tanh %26 : vector<8x32xf32>
    %28 = arith.mulf %21, %27 : vector<8x32xf32>
    %c0_13 = arith.constant 0 : index
    %c0_14 = arith.constant 0 : index
    %29 = vector.load %arg9[%c0_13, %c0_14] : memref<64x32xf32, #tpu.memory_space<vmem>>, vector<8x32xf32>
    tpu.vector_store %arg9[%c0_13, %c0_14], %28 {strides = array<i32>} : memref<64x32xf32, #tpu.memory_space<vmem>>, vector<8x32xf32>,
    %30 = vector.extract_strided_slice %6 {offsets = [8, 0], sizes = [8, 128], strides = [1, 1]} : vector<64x128xf32> to vector<8x128xf32>
    %cst_15 = arith.constant dense<0.000000e+00> : vector<8x128xf32>
    %31 = tpu.matmul %28, %2, %cst_15 {dimension_numbers = #tpu.dot_dimension_numbers<[1], [0], [0], [1], [0, 0, 1, 1], [], []>} : vector<8x32xf32>, vector<32x128xf32>, vector<8x128xf32> -> vector<8x128xf32>
    %32 = arith.addf %30, %31 : vector<8x128xf32>
    %cst_16 = arith.constant 0.000000e+00 : f32
    %33 = vector.broadcast %cst_16 : f32 to vector<8x128xf32>
    %34 = arith.subf %33, %32 : vector<8x128xf32>
    %35 = math.exp %34 : vector<8x128xf32>
    %cst_17 = arith.constant 1.000000e+00 : f32
    %36 = vector.broadcast %cst_17 : f32 to vector<8x128xf32>
    %37 = arith.addf %36, %35 : vector<8x128xf32>
    %cst_18 = arith.constant 1.000000e+00 : f32
    %38 = vector.broadcast %cst_18 : f32 to vector<8x128xf32>
    %39 = arith.divf %38, %37 : vector<8x128xf32>
    %40 = vector.extract_strided_slice %39 {offsets = [0, 0], sizes = [8, 32], strides = [1, 1]} : vector<8x128xf32> to vector<8x32xf32>
    %41 = vector.extract_strided_slice %39 {offsets = [0, 32], sizes = [8, 32], strides = [1, 1]} : vector<8x128xf32> to vector<8x32xf32>
    %42 = vector.extract_strided_slice %39 {offsets = [0, 96], sizes = [8, 32], strides = [1, 1]} : vector<8x128xf32> to vector<8x32xf32>
    %43 = vector.extract_strided_slice %32 {offsets = [0, 64], sizes = [8, 32], strides = [1, 1]} : vector<8x128xf32> to vector<8x32xf32>
    %44 = math.tanh %43 : vector<8x32xf32>
    %45 = arith.mulf %41, %26 : vector<8x32xf32>
    %46 = arith.mulf %40, %44 : vector<8x32xf32>
    %47 = arith.addf %45, %46 : vector<8x32xf32>
    %48 = math.tanh %47 : vector<8x32xf32>
    %49 = arith.mulf %42, %48 : vector<8x32xf32>
    %c8 = arith.constant 8 : index
    %c0_19 = arith.constant 0 : index
    %50 = vector.load %arg9[%c8, %c0_19] : memref<64x32xf32, #tpu.memory_space<vmem>>, vector<8x32xf32>
    tpu.vector_store %arg9[%c8, %c0_19], %49 {strides = array<i32>} : memref<64x32xf32, #tpu.memory_space<vmem>>, vector<8x32xf32>,
    %51 = vector.extract_strided_slice %6 {offsets = [16, 0], sizes = [8, 128], strides = [1, 1]} : vector<64x128xf32> to vector<8x128xf32>
    %cst_20 = arith.constant dense<0.000000e+00> : vector<8x128xf32>
    %52 = tpu.matmul %49, %2, %cst_20 {dimension_numbers = #tpu.dot_dimension_numbers<[1], [0], [0], [1], [0, 0, 1, 1], [], []>} : vector<8x32xf32>, vector<32x128xf32>, vector<8x128xf32> -> vector<8x128xf32>
    %53 = arith.addf %51, %52 : vector<8x128xf32>
    %cst_21 = arith.constant 0.000000e+00 : f32
    %54 = vector.broadcast %cst_21 : f32 to vector<8x128xf32>
    %55 = arith.subf %54, %53 : vector<8x128xf32>
    %56 = math.exp %55 : vector<8x128xf32>
    %cst_22 = arith.constant 1.000000e+00 : f32
    %57 = vector.broadcast %cst_22 : f32 to vector<8x128xf32>
    %58 = arith.addf %57, %56 : vector<8x128xf32>
    %cst_23 = arith.constant 1.000000e+00 : f32
    %59 = vector.broadcast %cst_23 : f32 to vector<8x128xf32>
    %60 = arith.divf %59, %58 : vector<8x128xf32>
    %61 = vector.extract_strided_slice %60 {offsets = [0, 0], sizes = [8, 32], strides = [1, 1]} : vector<8x128xf32> to vector<8x32xf32>
    %62 = vector.extract_strided_slice %60 {offsets = [0, 32], sizes = [8, 32], strides = [1, 1]} : vector<8x128xf32> to vector<8x32xf32>
    %63 = vector.extract_strided_slice %60 {offsets = [0, 96], sizes = [8, 32], strides = [1, 1]} : vector<8x128xf32> to vector<8x32xf32>
    %64 = vector.extract_strided_slice %53 {offsets = [0, 64], sizes = [8, 32], strides = [1, 1]} : vector<8x128xf32> to vector<8x32xf32>
    %65 = math.tanh %64 : vector<8x32xf32>
    %66 = arith.mulf %62, %47 : vector<8x32xf32>
    %67 = arith.mulf %61, %65 : vector<8x32xf32>
    %68 = arith.addf %66, %67 : vector<8x32xf32>
    %69 = math.tanh %68 : vector<8x32xf32>
    %70 = arith.mulf %63, %69 : vector<8x32xf32>
    %c16 = arith.constant 16 : index
    %c0_24 = arith.constant 0 : index
    %71 = vector.load %arg9[%c16, %c0_24] : memref<64x32xf32, #tpu.memory_space<vmem>>, vector<8x32xf32>
    tpu.vector_store %arg9[%c16, %c0_24], %70 {strides = array<i32>} : memref<64x32xf32, #tpu.memory_space<vmem>>, vector<8x32xf32>,
    %72 = vector.extract_strided_slice %6 {offsets = [24, 0], sizes = [8, 128], strides = [1, 1]} : vector<64x128xf32> to vector<8x128xf32>
    %cst_25 = arith.constant dense<0.000000e+00> : vector<8x128xf32>
    %73 = tpu.matmul %70, %2, %cst_25 {dimension_numbers = #tpu.dot_dimension_numbers<[1], [0], [0], [1], [0, 0, 1, 1], [], []>} : vector<8x32xf32>, vector<32x128xf32>, vector<8x128xf32> -> vector<8x128xf32>
    %74 = arith.addf %72, %73 : vector<8x128xf32>
    %cst_26 = arith.constant 0.000000e+00 : f32
    %75 = vector.broadcast %cst_26 : f32 to vector<8x128xf32>
    %76 = arith.subf %75, %74 : vector<8x128xf32>
    %77 = math.exp %76 : vector<8x128xf32>
    %cst_27 = arith.constant 1.000000e+00 : f32
    %78 = vector.broadcast %cst_27 : f32 to vector<8x128xf32>
    %79 = arith.addf %78, %77 : vector<8x128xf32>
    %cst_28 = arith.constant 1.000000e+00 : f32
    %80 = vector.broadcast %cst_28 : f32 to vector<8x128xf32>
    %81 = arith.divf %80, %79 : vector<8x128xf32>
    %82 = vector.extract_strided_slice %81 {offsets = [0, 0], sizes = [8, 32], strides = [1, 1]} : vector<8x128xf32> to vector<8x32xf32>
    %83 = vector.extract_strided_slice %81 {offsets = [0, 32], sizes = [8, 32], strides = [1, 1]} : vector<8x128xf32> to vector<8x32xf32>
    %84 = vector.extract_strided_slice %81 {offsets = [0, 96], sizes = [8, 32], strides = [1, 1]} : vector<8x128xf32> to vector<8x32xf32>
    %85 = vector.extract_strided_slice %74 {offsets = [0, 64], sizes = [8, 32], strides = [1, 1]} : vector<8x128xf32> to vector<8x32xf32>
    %86 = math.tanh %85 : vector<8x32xf32>
    %87 = arith.mulf %83, %68 : vector<8x32xf32>
    %88 = arith.mulf %82, %86 : vector<8x32xf32>
    %89 = arith.addf %87, %88 : vector<8x32xf32>
    %90 = math.tanh %89 : vector<8x32xf32>
    %91 = arith.mulf %84, %90 : vector<8x32xf32>
    %c24 = arith.constant 24 : index
    %c0_29 = arith.constant 0 : index
    %92 = vector.load %arg9[%c24, %c0_29] : memref<64x32xf32, #tpu.memory_space<vmem>>, vector<8x32xf32>
    tpu.vector_store %arg9[%c24, %c0_29], %91 {strides = array<i32>} : memref<64x32xf32, #tpu.memory_space<vmem>>, vector<8x32xf32>,
    %93 = vector.extract_strided_slice %6 {offsets = [32, 0], sizes = [8, 128], strides = [1, 1]} : vector<64x128xf32> to vector<8x128xf32>
    %cst_30 = arith.constant dense<0.000000e+00> : vector<8x128xf32>
    %94 = tpu.matmul %91, %2, %cst_30 {dimension_numbers = #tpu.dot_dimension_numbers<[1], [0], [0], [1], [0, 0, 1, 1], [], []>} : vector<8x32xf32>, vector<32x128xf32>, vector<8x128xf32> -> vector<8x128xf32>
    %95 = arith.addf %93, %94 : vector<8x128xf32>
    %cst_31 = arith.constant 0.000000e+00 : f32
    %96 = vector.broadcast %cst_31 : f32 to vector<8x128xf32>
    %97 = arith.subf %96, %95 : vector<8x128xf32>
    %98 = math.exp %97 : vector<8x128xf32>
    %cst_32 = arith.constant 1.000000e+00 : f32
    %99 = vector.broadcast %cst_32 : f32 to vector<8x128xf32>
    %100 = arith.addf %99, %98 : vector<8x128xf32>
    %cst_33 = arith.constant 1.000000e+00 : f32
    %101 = vector.broadcast %cst_33 : f32 to vector<8x128xf32>
    %102 = arith.divf %101, %100 : vector<8x128xf32>
    %103 = vector.extract_strided_slice %102 {offsets = [0, 0], sizes = [8, 32], strides = [1, 1]} : vector<8x128xf32> to vector<8x32xf32>
    %104 = vector.extract_strided_slice %102 {offsets = [0, 32], sizes = [8, 32], strides = [1, 1]} : vector<8x128xf32> to vector<8x32xf32>
    %105 = vector.extract_strided_slice %102 {offsets = [0, 96], sizes = [8, 32], strides = [1, 1]} : vector<8x128xf32> to vector<8x32xf32>
    %106 = vector.extract_strided_slice %95 {offsets = [0, 64], sizes = [8, 32], strides = [1, 1]} : vector<8x128xf32> to vector<8x32xf32>
    %107 = math.tanh %106 : vector<8x32xf32>
    %108 = arith.mulf %104, %89 : vector<8x32xf32>
    %109 = arith.mulf %103, %107 : vector<8x32xf32>
    %110 = arith.addf %108, %109 : vector<8x32xf32>
    %111 = math.tanh %110 : vector<8x32xf32>
    %112 = arith.mulf %105, %111 : vector<8x32xf32>
    %c32 = arith.constant 32 : index
    %c0_34 = arith.constant 0 : index
    %113 = vector.load %arg9[%c32, %c0_34] : memref<64x32xf32, #tpu.memory_space<vmem>>, vector<8x32xf32>
    tpu.vector_store %arg9[%c32, %c0_34], %112 {strides = array<i32>} : memref<64x32xf32, #tpu.memory_space<vmem>>, vector<8x32xf32>,
    %114 = vector.extract_strided_slice %6 {offsets = [40, 0], sizes = [8, 128], strides = [1, 1]} : vector<64x128xf32> to vector<8x128xf32>
    %cst_35 = arith.constant dense<0.000000e+00> : vector<8x128xf32>
    %115 = tpu.matmul %112, %2, %cst_35 {dimension_numbers = #tpu.dot_dimension_numbers<[1], [0], [0], [1], [0, 0, 1, 1], [], []>} : vector<8x32xf32>, vector<32x128xf32>, vector<8x128xf32> -> vector<8x128xf32>
    %116 = arith.addf %114, %115 : vector<8x128xf32>
    %cst_36 = arith.constant 0.000000e+00 : f32
    %117 = vector.broadcast %cst_36 : f32 to vector<8x128xf32>
    %118 = arith.subf %117, %116 : vector<8x128xf32>
    %119 = math.exp %118 : vector<8x128xf32>
    %cst_37 = arith.constant 1.000000e+00 : f32
    %120 = vector.broadcast %cst_37 : f32 to vector<8x128xf32>
    %121 = arith.addf %120, %119 : vector<8x128xf32>
    %cst_38 = arith.constant 1.000000e+00 : f32
    %122 = vector.broadcast %cst_38 : f32 to vector<8x128xf32>
    %123 = arith.divf %122, %121 : vector<8x128xf32>
    %124 = vector.extract_strided_slice %123 {offsets = [0, 0], sizes = [8, 32], strides = [1, 1]} : vector<8x128xf32> to vector<8x32xf32>
    %125 = vector.extract_strided_slice %123 {offsets = [0, 32], sizes = [8, 32], strides = [1, 1]} : vector<8x128xf32> to vector<8x32xf32>
    %126 = vector.extract_strided_slice %123 {offsets = [0, 96], sizes = [8, 32], strides = [1, 1]} : vector<8x128xf32> to vector<8x32xf32>
    %127 = vector.extract_strided_slice %116 {offsets = [0, 64], sizes = [8, 32], strides = [1, 1]} : vector<8x128xf32> to vector<8x32xf32>
    %128 = math.tanh %127 : vector<8x32xf32>
    %129 = arith.mulf %125, %110 : vector<8x32xf32>
    %130 = arith.mulf %124, %128 : vector<8x32xf32>
    %131 = arith.addf %129, %130 : vector<8x32xf32>
    %132 = math.tanh %131 : vector<8x32xf32>
    %133 = arith.mulf %126, %132 : vector<8x32xf32>
    %c40 = arith.constant 40 : index
    %c0_39 = arith.constant 0 : index
    %134 = vector.load %arg9[%c40, %c0_39] : memref<64x32xf32, #tpu.memory_space<vmem>>, vector<8x32xf32>
    tpu.vector_store %arg9[%c40, %c0_39], %133 {strides = array<i32>} : memref<64x32xf32, #tpu.memory_space<vmem>>, vector<8x32xf32>,
    %135 = vector.extract_strided_slice %6 {offsets = [48, 0], sizes = [8, 128], strides = [1, 1]} : vector<64x128xf32> to vector<8x128xf32>
    %cst_40 = arith.constant dense<0.000000e+00> : vector<8x128xf32>
    %136 = tpu.matmul %133, %2, %cst_40 {dimension_numbers = #tpu.dot_dimension_numbers<[1], [0], [0], [1], [0, 0, 1, 1], [], []>} : vector<8x32xf32>, vector<32x128xf32>, vector<8x128xf32> -> vector<8x128xf32>
    %137 = arith.addf %135, %136 : vector<8x128xf32>
    %cst_41 = arith.constant 0.000000e+00 : f32
    %138 = vector.broadcast %cst_41 : f32 to vector<8x128xf32>
    %139 = arith.subf %138, %137 : vector<8x128xf32>
    %140 = math.exp %139 : vector<8x128xf32>
    %cst_42 = arith.constant 1.000000e+00 : f32
    %141 = vector.broadcast %cst_42 : f32 to vector<8x128xf32>
    %142 = arith.addf %141, %140 : vector<8x128xf32>
    %cst_43 = arith.constant 1.000000e+00 : f32
    %143 = vector.broadcast %cst_43 : f32 to vector<8x128xf32>
    %144 = arith.divf %143, %142 : vector<8x128xf32>
    %145 = vector.extract_strided_slice %144 {offsets = [0, 0], sizes = [8, 32], strides = [1, 1]} : vector<8x128xf32> to vector<8x32xf32>
    %146 = vector.extract_strided_slice %144 {offsets = [0, 32], sizes = [8, 32], strides = [1, 1]} : vector<8x128xf32> to vector<8x32xf32>
    %147 = vector.extract_strided_slice %144 {offsets = [0, 96], sizes = [8, 32], strides = [1, 1]} : vector<8x128xf32> to vector<8x32xf32>
    %148 = vector.extract_strided_slice %137 {offsets = [0, 64], sizes = [8, 32], strides = [1, 1]} : vector<8x128xf32> to vector<8x32xf32>
    %149 = math.tanh %148 : vector<8x32xf32>
    %150 = arith.mulf %146, %131 : vector<8x32xf32>
    %151 = arith.mulf %145, %149 : vector<8x32xf32>
    %152 = arith.addf %150, %151 : vector<8x32xf32>
    %153 = math.tanh %152 : vector<8x32xf32>
    %154 = arith.mulf %147, %153 : vector<8x32xf32>
    %c48 = arith.constant 48 : index
    %c0_44 = arith.constant 0 : index
    %155 = vector.load %arg9[%c48, %c0_44] : memref<64x32xf32, #tpu.memory_space<vmem>>, vector<8x32xf32>
    tpu.vector_store %arg9[%c48, %c0_44], %154 {strides = array<i32>} : memref<64x32xf32, #tpu.memory_space<vmem>>, vector<8x32xf32>,
    %156 = vector.extract_strided_slice %6 {offsets = [56, 0], sizes = [8, 128], strides = [1, 1]} : vector<64x128xf32> to vector<8x128xf32>
    %cst_45 = arith.constant dense<0.000000e+00> : vector<8x128xf32>
    %157 = tpu.matmul %154, %2, %cst_45 {dimension_numbers = #tpu.dot_dimension_numbers<[1], [0], [0], [1], [0, 0, 1, 1], [], []>} : vector<8x32xf32>, vector<32x128xf32>, vector<8x128xf32> -> vector<8x128xf32>
    %158 = arith.addf %156, %157 : vector<8x128xf32>
    %cst_46 = arith.constant 0.000000e+00 : f32
    %159 = vector.broadcast %cst_46 : f32 to vector<8x128xf32>
    %160 = arith.subf %159, %158 : vector<8x128xf32>
    %161 = math.exp %160 : vector<8x128xf32>
    %cst_47 = arith.constant 1.000000e+00 : f32
    %162 = vector.broadcast %cst_47 : f32 to vector<8x128xf32>
    %163 = arith.addf %162, %161 : vector<8x128xf32>
    %cst_48 = arith.constant 1.000000e+00 : f32
    %164 = vector.broadcast %cst_48 : f32 to vector<8x128xf32>
    %165 = arith.divf %164, %163 : vector<8x128xf32>
    %166 = vector.extract_strided_slice %165 {offsets = [0, 0], sizes = [8, 32], strides = [1, 1]} : vector<8x128xf32> to vector<8x32xf32>
    %167 = vector.extract_strided_slice %165 {offsets = [0, 32], sizes = [8, 32], strides = [1, 1]} : vector<8x128xf32> to vector<8x32xf32>
    %168 = vector.extract_strided_slice %165 {offsets = [0, 96], sizes = [8, 32], strides = [1, 1]} : vector<8x128xf32> to vector<8x32xf32>
    %169 = vector.extract_strided_slice %158 {offsets = [0, 64], sizes = [8, 32], strides = [1, 1]} : vector<8x128xf32> to vector<8x32xf32>
    %170 = math.tanh %169 : vector<8x32xf32>
    %171 = arith.mulf %167, %152 : vector<8x32xf32>
    %172 = arith.mulf %166, %170 : vector<8x32xf32>
    %173 = arith.addf %171, %172 : vector<8x32xf32>
    %174 = math.tanh %173 : vector<8x32xf32>
    %175 = arith.mulf %168, %174 : vector<8x32xf32>
    %c56 = arith.constant 56 : index
    %c0_49 = arith.constant 0 : index
    %176 = vector.load %arg9[%c56, %c0_49] : memref<64x32xf32, #tpu.memory_space<vmem>>, vector<8x32xf32>
    tpu.vector_store %arg9[%c56, %c0_49], %175 {strides = array<i32>} : memref<64x32xf32, #tpu.memory_space<vmem>>, vector<8x32xf32>,
    %c0_50 = arith.constant 0 : index
    %c0_51 = arith.constant 0 : index
    %c0_52 = arith.constant 0 : index
    %177 = vector.load %arg8[%c0_50, %c0_51, %c0_52] : memref<4x8x32xf32, #tpu.memory_space<vmem>>, vector<1x8x32xf32>
    %178 = vector.shape_cast %177 : vector<1x8x32xf32> to vector<8x32xf32>
    %179 = vector.shape_cast %175 : vector<8x32xf32> to vector<1x8x32xf32>
    tpu.vector_store %arg8[%c0_50, %c0_51, %c0_52], %179 {strides = array<i32>} : memref<4x8x32xf32, #tpu.memory_space<vmem>>, vector<1x8x32xf32>,
    %c2 = arith.constant 2 : index
    %c0_53 = arith.constant 0 : index
    %c0_54 = arith.constant 0 : index
    %180 = vector.load %arg8[%c2, %c0_53, %c0_54] : memref<4x8x32xf32, #tpu.memory_space<vmem>>, vector<1x8x32xf32>
    %181 = vector.shape_cast %180 : vector<1x8x32xf32> to vector<8x32xf32>
    %182 = vector.shape_cast %173 : vector<8x32xf32> to vector<1x8x32xf32>
    tpu.vector_store %arg8[%c2, %c0_53, %c0_54], %182 {strides = array<i32>} : memref<4x8x32xf32, #tpu.memory_space<vmem>>, vector<1x8x32xf32>,
    %c0_55 = arith.constant 0 : index
    %c0_56 = arith.constant 0 : index
    %183 = vector.load %arg9[%c0_55, %c0_56] : memref<64x32xf32, #tpu.memory_space<vmem>>, vector<64x32xf32>
    %c0_57 = arith.constant 0 : index
    %c0_58 = arith.constant 0 : index
    %184 = vector.load %arg5[%c0_57, %c0_58] : memref<32x128xf32, #tpu.memory_space<vmem>>, vector<32x128xf32>
    %c0_59 = arith.constant 0 : index
    %c0_60 = arith.constant 0 : index
    %185 = vector.load %arg6[%c0_59, %c0_60] : memref<32x128xf32, #tpu.memory_space<vmem>>, vector<32x128xf32>
    %c0_61 = arith.constant 0 : index
    %c0_62 = arith.constant 0 : index
    %186 = vector.load %arg7[%c0_61, %c0_62] : memref<1x128xf32, #tpu.memory_space<vmem>>, vector<1x128xf32>
    %cst_63 = arith.constant dense<0.000000e+00> : vector<64x128xf32>
    %187 = tpu.matmul %183, %184, %cst_63 {dimension_numbers = #tpu.dot_dimension_numbers<[1], [0], [0], [1], [0, 0, 1, 1], [], []>} : vector<64x32xf32>, vector<32x128xf32>, vector<64x128xf32> -> vector<64x128xf32>
    %188 = vector.broadcast %186 : vector<1x128xf32> to vector<64x128xf32>
    %189 = arith.addf %187, %188 : vector<64x128xf32>
    %cst_64 = arith.constant 0.000000e+00 : f32
    %190 = vector.broadcast %cst_64 : f32 to vector<8x32xf32>
    %cst_65 = arith.constant 0.000000e+00 : f32
    %191 = vector.broadcast %cst_65 : f32 to vector<8x32xf32>
    %192 = vector.extract_strided_slice %189 {offsets = [0, 0], sizes = [8, 128], strides = [1, 1]} : vector<64x128xf32> to vector<8x128xf32>
    %cst_66 = arith.constant dense<0.000000e+00> : vector<8x128xf32>
    %193 = tpu.matmul %190, %185, %cst_66 {dimension_numbers = #tpu.dot_dimension_numbers<[1], [0], [0], [1], [0, 0, 1, 1], [], []>} : vector<8x32xf32>, vector<32x128xf32>, vector<8x128xf32> -> vector<8x128xf32>
    %194 = arith.addf %192, %193 : vector<8x128xf32>
    %cst_67 = arith.constant 0.000000e+00 : f32
    %195 = vector.broadcast %cst_67 : f32 to vector<8x128xf32>
    %196 = arith.subf %195, %194 : vector<8x128xf32>
    %197 = math.exp %196 : vector<8x128xf32>
    %cst_68 = arith.constant 1.000000e+00 : f32
    %198 = vector.broadcast %cst_68 : f32 to vector<8x128xf32>
    %199 = arith.addf %198, %197 : vector<8x128xf32>
    %cst_69 = arith.constant 1.000000e+00 : f32
    %200 = vector.broadcast %cst_69 : f32 to vector<8x128xf32>
    %201 = arith.divf %200, %199 : vector<8x128xf32>
    %202 = vector.extract_strided_slice %201 {offsets = [0, 0], sizes = [8, 32], strides = [1, 1]} : vector<8x128xf32> to vector<8x32xf32>
    %203 = vector.extract_strided_slice %201 {offsets = [0, 32], sizes = [8, 32], strides = [1, 1]} : vector<8x128xf32> to vector<8x32xf32>
    %204 = vector.extract_strided_slice %201 {offsets = [0, 96], sizes = [8, 32], strides = [1, 1]} : vector<8x128xf32> to vector<8x32xf32>
    %205 = vector.extract_strided_slice %194 {offsets = [0, 64], sizes = [8, 32], strides = [1, 1]} : vector<8x128xf32> to vector<8x32xf32>
    %206 = math.tanh %205 : vector<8x32xf32>
    %207 = arith.mulf %203, %191 : vector<8x32xf32>
    %208 = arith.mulf %202, %206 : vector<8x32xf32>
    %209 = arith.addf %207, %208 : vector<8x32xf32>
    %210 = math.tanh %209 : vector<8x32xf32>
    %211 = arith.mulf %204, %210 : vector<8x32xf32>
    %212 = vector.extract_strided_slice %189 {offsets = [8, 0], sizes = [8, 128], strides = [1, 1]} : vector<64x128xf32> to vector<8x128xf32>
    %cst_70 = arith.constant dense<0.000000e+00> : vector<8x128xf32>
    %213 = tpu.matmul %211, %185, %cst_70 {dimension_numbers = #tpu.dot_dimension_numbers<[1], [0], [0], [1], [0, 0, 1, 1], [], []>} : vector<8x32xf32>, vector<32x128xf32>, vector<8x128xf32> -> vector<8x128xf32>
    %214 = arith.addf %212, %213 : vector<8x128xf32>
    %cst_71 = arith.constant 0.000000e+00 : f32
    %215 = vector.broadcast %cst_71 : f32 to vector<8x128xf32>
    %216 = arith.subf %215, %214 : vector<8x128xf32>
    %217 = math.exp %216 : vector<8x128xf32>
    %cst_72 = arith.constant 1.000000e+00 : f32
    %218 = vector.broadcast %cst_72 : f32 to vector<8x128xf32>
    %219 = arith.addf %218, %217 : vector<8x128xf32>
    %cst_73 = arith.constant 1.000000e+00 : f32
    %220 = vector.broadcast %cst_73 : f32 to vector<8x128xf32>
    %221 = arith.divf %220, %219 : vector<8x128xf32>
    %222 = vector.extract_strided_slice %221 {offsets = [0, 0], sizes = [8, 32], strides = [1, 1]} : vector<8x128xf32> to vector<8x32xf32>
    %223 = vector.extract_strided_slice %221 {offsets = [0, 32], sizes = [8, 32], strides = [1, 1]} : vector<8x128xf32> to vector<8x32xf32>
    %224 = vector.extract_strided_slice %221 {offsets = [0, 96], sizes = [8, 32], strides = [1, 1]} : vector<8x128xf32> to vector<8x32xf32>
    %225 = vector.extract_strided_slice %214 {offsets = [0, 64], sizes = [8, 32], strides = [1, 1]} : vector<8x128xf32> to vector<8x32xf32>
    %226 = math.tanh %225 : vector<8x32xf32>
    %227 = arith.mulf %223, %209 : vector<8x32xf32>
    %228 = arith.mulf %222, %226 : vector<8x32xf32>
    %229 = arith.addf %227, %228 : vector<8x32xf32>
    %230 = math.tanh %229 : vector<8x32xf32>
    %231 = arith.mulf %224, %230 : vector<8x32xf32>
    %232 = vector.extract_strided_slice %189 {offsets = [16, 0], sizes = [8, 128], strides = [1, 1]} : vector<64x128xf32> to vector<8x128xf32>
    %cst_74 = arith.constant dense<0.000000e+00> : vector<8x128xf32>
    %233 = tpu.matmul %231, %185, %cst_74 {dimension_numbers = #tpu.dot_dimension_numbers<[1], [0], [0], [1], [0, 0, 1, 1], [], []>} : vector<8x32xf32>, vector<32x128xf32>, vector<8x128xf32> -> vector<8x128xf32>
    %234 = arith.addf %232, %233 : vector<8x128xf32>
    %cst_75 = arith.constant 0.000000e+00 : f32
    %235 = vector.broadcast %cst_75 : f32 to vector<8x128xf32>
    %236 = arith.subf %235, %234 : vector<8x128xf32>
    %237 = math.exp %236 : vector<8x128xf32>
    %cst_76 = arith.constant 1.000000e+00 : f32
    %238 = vector.broadcast %cst_76 : f32 to vector<8x128xf32>
    %239 = arith.addf %238, %237 : vector<8x128xf32>
    %cst_77 = arith.constant 1.000000e+00 : f32
    %240 = vector.broadcast %cst_77 : f32 to vector<8x128xf32>
    %241 = arith.divf %240, %239 : vector<8x128xf32>
    %242 = vector.extract_strided_slice %241 {offsets = [0, 0], sizes = [8, 32], strides = [1, 1]} : vector<8x128xf32> to vector<8x32xf32>
    %243 = vector.extract_strided_slice %241 {offsets = [0, 32], sizes = [8, 32], strides = [1, 1]} : vector<8x128xf32> to vector<8x32xf32>
    %244 = vector.extract_strided_slice %241 {offsets = [0, 96], sizes = [8, 32], strides = [1, 1]} : vector<8x128xf32> to vector<8x32xf32>
    %245 = vector.extract_strided_slice %234 {offsets = [0, 64], sizes = [8, 32], strides = [1, 1]} : vector<8x128xf32> to vector<8x32xf32>
    %246 = math.tanh %245 : vector<8x32xf32>
    %247 = arith.mulf %243, %229 : vector<8x32xf32>
    %248 = arith.mulf %242, %246 : vector<8x32xf32>
    %249 = arith.addf %247, %248 : vector<8x32xf32>
    %250 = math.tanh %249 : vector<8x32xf32>
    %251 = arith.mulf %244, %250 : vector<8x32xf32>
    %252 = vector.extract_strided_slice %189 {offsets = [24, 0], sizes = [8, 128], strides = [1, 1]} : vector<64x128xf32> to vector<8x128xf32>
    %cst_78 = arith.constant dense<0.000000e+00> : vector<8x128xf32>
    %253 = tpu.matmul %251, %185, %cst_78 {dimension_numbers = #tpu.dot_dimension_numbers<[1], [0], [0], [1], [0, 0, 1, 1], [], []>} : vector<8x32xf32>, vector<32x128xf32>, vector<8x128xf32> -> vector<8x128xf32>
    %254 = arith.addf %252, %253 : vector<8x128xf32>
    %cst_79 = arith.constant 0.000000e+00 : f32
    %255 = vector.broadcast %cst_79 : f32 to vector<8x128xf32>
    %256 = arith.subf %255, %254 : vector<8x128xf32>
    %257 = math.exp %256 : vector<8x128xf32>
    %cst_80 = arith.constant 1.000000e+00 : f32
    %258 = vector.broadcast %cst_80 : f32 to vector<8x128xf32>
    %259 = arith.addf %258, %257 : vector<8x128xf32>
    %cst_81 = arith.constant 1.000000e+00 : f32
    %260 = vector.broadcast %cst_81 : f32 to vector<8x128xf32>
    %261 = arith.divf %260, %259 : vector<8x128xf32>
    %262 = vector.extract_strided_slice %261 {offsets = [0, 0], sizes = [8, 32], strides = [1, 1]} : vector<8x128xf32> to vector<8x32xf32>
    %263 = vector.extract_strided_slice %261 {offsets = [0, 32], sizes = [8, 32], strides = [1, 1]} : vector<8x128xf32> to vector<8x32xf32>
    %264 = vector.extract_strided_slice %261 {offsets = [0, 96], sizes = [8, 32], strides = [1, 1]} : vector<8x128xf32> to vector<8x32xf32>
    %265 = vector.extract_strided_slice %254 {offsets = [0, 64], sizes = [8, 32], strides = [1, 1]} : vector<8x128xf32> to vector<8x32xf32>
    %266 = math.tanh %265 : vector<8x32xf32>
    %267 = arith.mulf %263, %249 : vector<8x32xf32>
    %268 = arith.mulf %262, %266 : vector<8x32xf32>
    %269 = arith.addf %267, %268 : vector<8x32xf32>
    %270 = math.tanh %269 : vector<8x32xf32>
    %271 = arith.mulf %264, %270 : vector<8x32xf32>
    %272 = vector.extract_strided_slice %189 {offsets = [32, 0], sizes = [8, 128], strides = [1, 1]} : vector<64x128xf32> to vector<8x128xf32>
    %cst_82 = arith.constant dense<0.000000e+00> : vector<8x128xf32>
    %273 = tpu.matmul %271, %185, %cst_82 {dimension_numbers = #tpu.dot_dimension_numbers<[1], [0], [0], [1], [0, 0, 1, 1], [], []>} : vector<8x32xf32>, vector<32x128xf32>, vector<8x128xf32> -> vector<8x128xf32>
    %274 = arith.addf %272, %273 : vector<8x128xf32>
    %cst_83 = arith.constant 0.000000e+00 : f32
    %275 = vector.broadcast %cst_83 : f32 to vector<8x128xf32>
    %276 = arith.subf %275, %274 : vector<8x128xf32>
    %277 = math.exp %276 : vector<8x128xf32>
    %cst_84 = arith.constant 1.000000e+00 : f32
    %278 = vector.broadcast %cst_84 : f32 to vector<8x128xf32>
    %279 = arith.addf %278, %277 : vector<8x128xf32>
    %cst_85 = arith.constant 1.000000e+00 : f32
    %280 = vector.broadcast %cst_85 : f32 to vector<8x128xf32>
    %281 = arith.divf %280, %279 : vector<8x128xf32>
    %282 = vector.extract_strided_slice %281 {offsets = [0, 0], sizes = [8, 32], strides = [1, 1]} : vector<8x128xf32> to vector<8x32xf32>
    %283 = vector.extract_strided_slice %281 {offsets = [0, 32], sizes = [8, 32], strides = [1, 1]} : vector<8x128xf32> to vector<8x32xf32>
    %284 = vector.extract_strided_slice %281 {offsets = [0, 96], sizes = [8, 32], strides = [1, 1]} : vector<8x128xf32> to vector<8x32xf32>
    %285 = vector.extract_strided_slice %274 {offsets = [0, 64], sizes = [8, 32], strides = [1, 1]} : vector<8x128xf32> to vector<8x32xf32>
    %286 = math.tanh %285 : vector<8x32xf32>
    %287 = arith.mulf %283, %269 : vector<8x32xf32>
    %288 = arith.mulf %282, %286 : vector<8x32xf32>
    %289 = arith.addf %287, %288 : vector<8x32xf32>
    %290 = math.tanh %289 : vector<8x32xf32>
    %291 = arith.mulf %284, %290 : vector<8x32xf32>
    %292 = vector.extract_strided_slice %189 {offsets = [40, 0], sizes = [8, 128], strides = [1, 1]} : vector<64x128xf32> to vector<8x128xf32>
    %cst_86 = arith.constant dense<0.000000e+00> : vector<8x128xf32>
    %293 = tpu.matmul %291, %185, %cst_86 {dimension_numbers = #tpu.dot_dimension_numbers<[1], [0], [0], [1], [0, 0, 1, 1], [], []>} : vector<8x32xf32>, vector<32x128xf32>, vector<8x128xf32> -> vector<8x128xf32>
    %294 = arith.addf %292, %293 : vector<8x128xf32>
    %cst_87 = arith.constant 0.000000e+00 : f32
    %295 = vector.broadcast %cst_87 : f32 to vector<8x128xf32>
    %296 = arith.subf %295, %294 : vector<8x128xf32>
    %297 = math.exp %296 : vector<8x128xf32>
    %cst_88 = arith.constant 1.000000e+00 : f32
    %298 = vector.broadcast %cst_88 : f32 to vector<8x128xf32>
    %299 = arith.addf %298, %297 : vector<8x128xf32>
    %cst_89 = arith.constant 1.000000e+00 : f32
    %300 = vector.broadcast %cst_89 : f32 to vector<8x128xf32>
    %301 = arith.divf %300, %299 : vector<8x128xf32>
    %302 = vector.extract_strided_slice %301 {offsets = [0, 0], sizes = [8, 32], strides = [1, 1]} : vector<8x128xf32> to vector<8x32xf32>
    %303 = vector.extract_strided_slice %301 {offsets = [0, 32], sizes = [8, 32], strides = [1, 1]} : vector<8x128xf32> to vector<8x32xf32>
    %304 = vector.extract_strided_slice %301 {offsets = [0, 96], sizes = [8, 32], strides = [1, 1]} : vector<8x128xf32> to vector<8x32xf32>
    %305 = vector.extract_strided_slice %294 {offsets = [0, 64], sizes = [8, 32], strides = [1, 1]} : vector<8x128xf32> to vector<8x32xf32>
    %306 = math.tanh %305 : vector<8x32xf32>
    %307 = arith.mulf %303, %289 : vector<8x32xf32>
    %308 = arith.mulf %302, %306 : vector<8x32xf32>
    %309 = arith.addf %307, %308 : vector<8x32xf32>
    %310 = math.tanh %309 : vector<8x32xf32>
    %311 = arith.mulf %304, %310 : vector<8x32xf32>
    %312 = vector.extract_strided_slice %189 {offsets = [48, 0], sizes = [8, 128], strides = [1, 1]} : vector<64x128xf32> to vector<8x128xf32>
    %cst_90 = arith.constant dense<0.000000e+00> : vector<8x128xf32>
    %313 = tpu.matmul %311, %185, %cst_90 {dimension_numbers = #tpu.dot_dimension_numbers<[1], [0], [0], [1], [0, 0, 1, 1], [], []>} : vector<8x32xf32>, vector<32x128xf32>, vector<8x128xf32> -> vector<8x128xf32>
    %314 = arith.addf %312, %313 : vector<8x128xf32>
    %cst_91 = arith.constant 0.000000e+00 : f32
    %315 = vector.broadcast %cst_91 : f32 to vector<8x128xf32>
    %316 = arith.subf %315, %314 : vector<8x128xf32>
    %317 = math.exp %316 : vector<8x128xf32>
    %cst_92 = arith.constant 1.000000e+00 : f32
    %318 = vector.broadcast %cst_92 : f32 to vector<8x128xf32>
    %319 = arith.addf %318, %317 : vector<8x128xf32>
    %cst_93 = arith.constant 1.000000e+00 : f32
    %320 = vector.broadcast %cst_93 : f32 to vector<8x128xf32>
    %321 = arith.divf %320, %319 : vector<8x128xf32>
    %322 = vector.extract_strided_slice %321 {offsets = [0, 0], sizes = [8, 32], strides = [1, 1]} : vector<8x128xf32> to vector<8x32xf32>
    %323 = vector.extract_strided_slice %321 {offsets = [0, 32], sizes = [8, 32], strides = [1, 1]} : vector<8x128xf32> to vector<8x32xf32>
    %324 = vector.extract_strided_slice %321 {offsets = [0, 96], sizes = [8, 32], strides = [1, 1]} : vector<8x128xf32> to vector<8x32xf32>
    %325 = vector.extract_strided_slice %314 {offsets = [0, 64], sizes = [8, 32], strides = [1, 1]} : vector<8x128xf32> to vector<8x32xf32>
    %326 = math.tanh %325 : vector<8x32xf32>
    %327 = arith.mulf %323, %309 : vector<8x32xf32>
    %328 = arith.mulf %322, %326 : vector<8x32xf32>
    %329 = arith.addf %327, %328 : vector<8x32xf32>
    %330 = math.tanh %329 : vector<8x32xf32>
    %331 = arith.mulf %324, %330 : vector<8x32xf32>
    %332 = vector.extract_strided_slice %189 {offsets = [56, 0], sizes = [8, 128], strides = [1, 1]} : vector<64x128xf32> to vector<8x128xf32>
    %cst_94 = arith.constant dense<0.000000e+00> : vector<8x128xf32>
    %333 = tpu.matmul %331, %185, %cst_94 {dimension_numbers = #tpu.dot_dimension_numbers<[1], [0], [0], [1], [0, 0, 1, 1], [], []>} : vector<8x32xf32>, vector<32x128xf32>, vector<8x128xf32> -> vector<8x128xf32>
    %334 = arith.addf %332, %333 : vector<8x128xf32>
    %cst_95 = arith.constant 0.000000e+00 : f32
    %335 = vector.broadcast %cst_95 : f32 to vector<8x128xf32>
    %336 = arith.subf %335, %334 : vector<8x128xf32>
    %337 = math.exp %336 : vector<8x128xf32>
    %cst_96 = arith.constant 1.000000e+00 : f32
    %338 = vector.broadcast %cst_96 : f32 to vector<8x128xf32>
    %339 = arith.addf %338, %337 : vector<8x128xf32>
    %cst_97 = arith.constant 1.000000e+00 : f32
    %340 = vector.broadcast %cst_97 : f32 to vector<8x128xf32>
    %341 = arith.divf %340, %339 : vector<8x128xf32>
    %342 = vector.extract_strided_slice %341 {offsets = [0, 0], sizes = [8, 32], strides = [1, 1]} : vector<8x128xf32> to vector<8x32xf32>
    %343 = vector.extract_strided_slice %341 {offsets = [0, 32], sizes = [8, 32], strides = [1, 1]} : vector<8x128xf32> to vector<8x32xf32>
    %344 = vector.extract_strided_slice %341 {offsets = [0, 96], sizes = [8, 32], strides = [1, 1]} : vector<8x128xf32> to vector<8x32xf32>
    %345 = vector.extract_strided_slice %334 {offsets = [0, 64], sizes = [8, 32], strides = [1, 1]} : vector<8x128xf32> to vector<8x32xf32>
    %346 = math.tanh %345 : vector<8x32xf32>
    %347 = arith.mulf %343, %329 : vector<8x32xf32>
    %348 = arith.mulf %342, %346 : vector<8x32xf32>
    %349 = arith.addf %347, %348 : vector<8x32xf32>
    %350 = math.tanh %349 : vector<8x32xf32>
    %351 = arith.mulf %344, %350 : vector<8x32xf32>
    %c1 = arith.constant 1 : index
    %c0_98 = arith.constant 0 : index
    %c0_99 = arith.constant 0 : index
    %352 = vector.load %arg8[%c1, %c0_98, %c0_99] : memref<4x8x32xf32, #tpu.memory_space<vmem>>, vector<1x8x32xf32>
    %353 = vector.shape_cast %352 : vector<1x8x32xf32> to vector<8x32xf32>
    %354 = vector.shape_cast %351 : vector<8x32xf32> to vector<1x8x32xf32>
    tpu.vector_store %arg8[%c1, %c0_98, %c0_99], %354 {strides = array<i32>} : memref<4x8x32xf32, #tpu.memory_space<vmem>>, vector<1x8x32xf32>,
    %c3 = arith.constant 3 : index
    %c0_100 = arith.constant 0 : index
    %c0_101 = arith.constant 0 : index
    %355 = vector.load %arg8[%c3, %c0_100, %c0_101] : memref<4x8x32xf32, #tpu.memory_space<vmem>>, vector<1x8x32xf32>
    %356 = vector.shape_cast %355 : vector<1x8x32xf32> to vector<8x32xf32>
    %357 = vector.shape_cast %349 : vector<8x32xf32> to vector<1x8x32xf32>
    tpu.vector_store %arg8[%c3, %c0_100, %c0_101], %357 {strides = array<i32>} : memref<4x8x32xf32, #tpu.memory_space<vmem>>, vector<1x8x32xf32>,
    return
  }
  func.func @transform_0(%arg0: i32) -> (i32, i32) {
    %c0_i32 = arith.constant 0 : i32
    %c0_i32_0 = arith.constant 0 : i32
    %c0_i32_1 = arith.constant 0 : i32
    return %c0_i32, %c0_i32_0 : i32, i32
  }
  func.func @transform_1(%arg0: i32) -> (i32, i32) {
    %c0_i32 = arith.constant 0 : i32
    %c0_i32_0 = arith.constant 0 : i32
    %c0_i32_1 = arith.constant 0 : i32
    return %c0_i32, %c0_i32_0 : i32, i32
  }
  func.func @transform_2(%arg0: i32) -> (i32, i32) {
    %c0_i32 = arith.constant 0 : i32
    %c0_i32_0 = arith.constant 0 : i32
    %c0_i32_1 = arith.constant 0 : i32
    return %c0_i32, %c0_i32_0 : i32, i32
  }
  func.func @transform_3(%arg0: i32) -> (i32, i32) {
    %c0_i32 = arith.constant 0 : i32
    %c0_i32_0 = arith.constant 0 : i32
    %c0_i32_1 = arith.constant 0 : i32
    return %c0_i32, %c0_i32_0 : i32, i32
  }
  func.func @transform_4(%arg0: i32) -> (i32, i32) {
    %c0_i32 = arith.constant 0 : i32
    %c0_i32_0 = arith.constant 0 : i32
    %c0_i32_1 = arith.constant 0 : i32
    return %c0_i32, %c0_i32_0 : i32, i32
  }
  func.func @transform_5(%arg0: i32) -> (i32, i32) {
    %c0_i32 = arith.constant 0 : i32
    %c0_i32_0 = arith.constant 0 : i32
    %c0_i32_1 = arith.constant 0 : i32
    return %c0_i32, %c0_i32_0 : i32, i32
  }
  func.func @transform_6(%arg0: i32) -> (i32, i32) {
    %c0_i32 = arith.constant 0 : i32
    %c0_i32_0 = arith.constant 0 : i32
    %c0_i32_1 = arith.constant 0 : i32
    return %c0_i32, %c0_i32_0 : i32, i32
  }
  func.func @transform_7(%arg0: i32) -> (i32, i32, i32) {
    %c0_i32 = arith.constant 0 : i32
    %c0_i32_0 = arith.constant 0 : i32
    %c0_i32_1 = arith.constant 0 : i32
    %c0_i32_2 = arith.constant 0 : i32
    return %c0_i32, %c0_i32_0, %c0_i32_1 : i32, i32, i32
  }
}

</mosaic_0001>

<bundles_post_ra>
// kernel: lstm_encoder_forward.1
= control target key start
LH: loop header
LB: loop body
LE: loop exit
PB: predicated region body
PF: predicated region fallthrough
CT: control target
= control target key end

     0   :  { %vm47_vm0 = vcmask 130048   ;;  %v2556_v0 = vmov 0.0|0.0   ;;  %vm2557_vm1 = vmmov 0   ;;  %v2558_v4 = vmov 0.0   ;;  %s2559_s17 = smov 64   ;;  %s2561_s22 = smov 96   ;;  %s2959_s1 = inlined_call_operand.vmem [shape: f32[16,128], index: 1, kind: input, shape index: {}]   ;;  %s2960_s2 = inlined_call_operand.vmem [shape: f32[32,128], index: 2, kind: input, shape index: {}]   ;;  %s2961_s0 = inlined_call_operand.vmem [shape: f32[64,16], index: 0, kind: input, shape index: {}]   ;;  %s2962_s3 = inlined_call_operand.vmem [shape: f32[1,128], index: 3, kind: input, shape index: {}]   ;;  %s2963_s4 = inlined_call_operand.vmem [shape: f32[32,128], index: 4, kind: input, shape index: {}]   ;;  %s2964_s5 = inlined_call_operand.vmem [shape: f32[32,128], index: 5, kind: input, shape index: {}]   ;;  %s2965_s6 = inlined_call_operand.vmem [shape: f32[1,128], index: 6, kind: input, shape index: {}]   ;;  %s2966_s7 = inlined_call_operand.vmem [shape: f32[4,8,32], index: 7, kind: output, shape index: {}]  }
   0x1   :  { %2318 = vmatprep.subr.bf16.mxu1 %v2556_v0  ;;  %v34_v1 = vld [vmem:[%s2959_s1] sm:$0xff]  ;;  %v35_v2 = vld [vmem:[%s2959_s1 + $0x8] sm:$0xff]  ;;  %2126 = vmatprep.mubr.msk.f32.mxu1 %vm2557_vm1, %v2558_v4  ;;  %v38_v9 = vld [vmem:[%s2960_s2 + $0x10] sm:$0xff]  ;;  %vm177_vm2 = vcmask 261120  }
   0x2   :  { %v36_v3 = vld [vmem:[%s2960_s2] sm:$0xff]  ;;  %v2314_v5 = vpack.c.bf16 %v35_v2, %v34_v1  ;;  %v37_v6 = vld [vmem:[%s2960_s2 + $0x8] sm:$0xff]  ;;  %v39_v10 = vld [vmem:[%s2960_s2 + $0x18] sm:$0xff] }
   0x3   :  { %v26_v7 = vld [vmem:[%s2961_s0] sm:$0xff]  ;;  %v2620_v8 = vpack.c.bf16 %v37_v6, %v36_v3  ;;  %v27_v11 = vld [vmem:[%s2961_s0 + $0x8] sm:$0xff]  ;;  %v2633_v12 = vpack.c.bf16 %v39_v10, %v38_v9  ;;  %v28_v50 = vld [vmem:[%s2961_s0 + $0x10] sm:$0xff] }
   0x4   :  { %2106 = vmatprep.mubr.msk.f32.mxu0 %vm47_vm0, %v26_v7  ;;  %2315 = vmatprep.subr.bf16.mxu0 %v2314_v5  ;;  %v2654_v13 = vld [vmem:[%s2962_s3] ss:$0 sm:$0xff]  ;;  %s2560_s3 = smov 32   ;;  %v29_v51 = vld [vmem:[%s2961_s0 + $0x18] sm:$0xff]  ;;  %v31_v53 = vld [vmem:[%s2961_s0 + $0x28] sm:$0xff] }
   0x5   :  { %2320 = vmatpush3.bf16.msra.mxu1 %v2620_v8  ;;  %2317 = vmatpush3.bf16.msra.mxu0 %v2314_v5  ;;  %v30_v52 = vld [vmem:[%s2961_s0 + $0x20] sm:$0xff]  ;;  %v32_v54 = vld [vmem:[%s2961_s0 + $0x30] sm:$0xff]  ;;  %v33_v55 = vld [vmem:[%s2961_s0 + $0x38] sm:$0xff] }
   0x6   :  { %2321 = vmatprep.subr.bf16.mxu1 %v2556_v0  ;;  %2330 = vmatprep.subr.bf16.mxu0 %v2556_v0 }
   0x8   :  { %2107 = vmatmul.mubr.msk.f32.vlgmr.msra.gmra.mrb[0].mxu0 %vm47_vm0, %v27_v11 }
   0x9   :  { %2323 = vmatpush3.bf16.msra.mxu1 %v2633_v12  ;;  %2332 = vmatpush3.bf16.msra.mxu0 %v2620_v8 }
   0xa   :  { %2324 = vmatprep.subr.bf16.mxu1 %v2556_v0  ;;  %2333 = vmatprep.subr.bf16.mxu0 %v2556_v0 }
   0xb   :  { %2109 = vmatprep.mubr.msk.f32.mxu0 %vm47_vm0, %v28_v50 }
   0xc   :  { %2127 = vmatmul.mubr.f32.vlgmr.msra.gmra.mrb[0].mxu1 %v2558_v4  ;;  %2110 = vmatmul.mubr.msk.f32.gmra.mrb[2].mxu0 %vm47_vm0, %v29_v51 }
   0xd   :  { %2326 = vmatpush3.bf16.msra.mxu1 %v2620_v8  ;;  %2137 = vmatprep.mubr.msk.f32.mxu1 %vm2557_vm1, %v2558_v4 }
   0xe   :  { %2327 = vmatprep.subr.bf16.mxu1 %v2556_v0  ;;  %2335 = vmatpush3.bf16.msra.mxu0 %v2633_v12 }
   0xf   :  { %2342 = vmatprep.subr.bf16.mxu0 %v2556_v0  ;;  %2112 = vmatprep.mubr.msk.f32.mxu0 %vm47_vm0, %v30_v52 }
  0x10   :  { %2113 = vmatmul.mubr.msk.f32.gmra.mrb[4].mxu0 %vm47_vm0, %v31_v53 }
  0x11   :  { %2329 = vmatpush3.bf16.msra.mxu1 %v2633_v12  ;;  %2115 = vmatprep.mubr.msk.f32.mxu0 %vm47_vm0, %v32_v54 }
  0x12   :  { %2336 = vmatprep.subr.bf16.mxu1 %v2556_v0 }
  0x14   :  { %2116 = vmatmul.mubr.msk.f32.gmra.mrb[6].mxu0 %vm47_vm0, %v33_v55 }
  0x15   :  { %2148 = vmatprep.mubr.msk.f32.mxu0 %vm2557_vm1, %v2558_v4 }
  0xdb   :  { %v2108_v14 = vpop.f32.mrb[0].mxu0 }
  0xdc   :  { %v138_v15 = vpop.f32.mrb[1].mxu0  ;;  %v144_v35 = vadd.f32 %v2108_v14, %v2654_v13 }
  0xdd   :  { %v139_v16 = vadd.f32 %v2654_v13, %v138_v15 }
  0xdf   :  { %v247_v17 = vpop.f32.mrb[0].mxu1  ;;  %v2111_v59 = vpop.f32.mrb[2].mxu0 }
  0xe0   :  { %v251_v18 = vadd.f32 %v247_v17, %v139_v16  ;;  %v2128_v19 = vpop.f32.mrb[1].mxu1  ;;  %v148_v60 = vpop.f32.mrb[3].mxu0 }
  0xe1   :  { %v149_v3 = vadd.f32 %v2654_v13, %v148_v60 }
  0xe2   :  { %2428 = vtanh.f32 %v251_v18  ;;  %v252_v21 = vsub.f32 0.0, %v251_v18 }
  0xe3   :  { %v2700_v61 = vpop.f32.mrb[4].mxu0 }
  0xe4   :  { %v253_v22 = vmul.f32 1.442695, %v252_v21  ;;  %v2702_v62 = vpop.f32.mrb[5].mxu0 }
  0xe6   :  { %2430 = vpow2.f32 %v253_v22 }
  0xe7   :  { %v2704_v63 = vpop.f32.mrb[6].mxu0 }
  0xe8   :  { %v2706_v1 = vpop.f32.mrb[7].mxu0 }
  0xec   :  { %v2429_v20 = vpop.eup %2428 }
  0xed   :  { %261 = vrot.lane.b32.xlu0 %v2429_v20, %s2559_s17 }
  0xf0   :  { %v2431_v23 = vpop.eup %2430 }
  0xf1   :  { %v255_v24 = vadd.f32 1.0, %v2431_v23 }
  0xf3   :  { %2432 = vrcp.f32 %v255_v24 }
  0xfd   :  { %v2433_v25 = vpop.eup %2432 }
  0xfe   :  { %v259_v28 = vmul.f32 0.0, %v2433_v25 }
 0x15f   :  { %v262_v26 = vpop.permute.xlu0 %261 }
 0x160   :  { %v264_v27 = vmul.f32 %v2433_v25, %v262_v26  ;;  %v154_v26 = vadd.f32 %v2111_v59, %v2654_v13 }
 0x162   :  { %266 = vrot.lane.b32.xlu0 %v264_v27, %s2560_s3 }
 0x1d4   :  { %v267_v29 = vpop.permute.xlu0 %266 }
 0x1d5   :  { %v269_v30 = vadd.f32 %v267_v29, %v259_v28 }
 0x1d7   :  { %2434 = vtanh.f32 %v269_v30 }
 0x1e1   :  { %v2435_v31 = vpop.eup %2434 }
 0x1e2   :  { %272 = vrot.lane.b32.xlu1 %v2435_v31, %s2559_s17 }
 0x254   :  { %v273_v32 = vpop.permute.xlu1 %272 }
 0x255   :  { %v275_v33 = vmul.f32 %v2433_v25, %v273_v32 }
 0x257   :  { %277 = vrot.lane.b32.xlu1 %v275_v33, %s2560_s3 }
 0x2c9   :  { %v278_v34 = vpop.permute.xlu1 %277 }
 0x2ca   :  { %280 = vst.msk [vmem:[#allocation2] sm:$0xff] %vm177_vm2, %v278_v34  ;;  %2138 = vmatmul.mubr.msk.f32.vlgmr.msra.gmra.mrb[2].mxu1 %vm177_vm2, %v278_v34 }
 0x2cb   :  { %2338 = vmatpush3.bf16.msra.mxu1 %v2620_v8  ;;  %2159 = vmatprep.mubr.msk.f32.mxu1 %vm2557_vm1, %v2558_v4 }
 0x2cc   :  { %2339 = vmatprep.subr.bf16.mxu1 %v2556_v0 }
 0x2cf   :  { %2341 = vmatpush3.bf16.msra.mxu1 %v2633_v12 }
 0x2d0   :  { %2348 = vmatprep.subr.bf16.mxu1 %v2556_v0 }
 0x39d   :  { %v349_v36 = vpop.f32.mrb[2].mxu1 }
 0x39e   :  { %v353_v37 = vadd.f32 %v349_v36, %v144_v35  ;;  %v2139_v38 = vpop.f32.mrb[3].mxu1 }
 0x3a0   :  { %2436 = vtanh.f32 %v353_v37  ;;  %v354_v40 = vsub.f32 0.0, %v353_v37 }
 0x3a2   :  { %v355_v41 = vmul.f32 1.442695, %v354_v40 }
 0x3a4   :  { %2438 = vpow2.f32 %v355_v41 }
 0x3aa   :  { %v2437_v39 = vpop.eup %2436 }
 0x3ab   :  { %363 = vrot.lane.b32.xlu0 %v2437_v39, %s2559_s17 }
 0x3ae   :  { %v2439_v42 = vpop.eup %2438 }
 0x3af   :  { %v357_v43 = vadd.f32 1.0, %v2439_v42 }
 0x3b1   :  { %2440 = vrcp.f32 %v357_v43 }
 0x3bb   :  { %v2441_v44 = vpop.eup %2440 }
 0x3bc   :  { %v361_v47 = vmul.f32 %v2441_v44, %v269_v30 }
 0x41d   :  { %v364_v45 = vpop.permute.xlu0 %363 }
 0x41e   :  { %v366_v46 = vmul.f32 %v2441_v44, %v364_v45  ;;  %v159_v45 = vadd.f32 %v2654_v13, %v2702_v62 }
 0x420   :  { %368 = vrot.lane.b32.xlu1 %v366_v46, %s2560_s3 }
 0x492   :  { %v369_v48 = vpop.permute.xlu1 %368 }
 0x493   :  { %v371_v49 = vadd.f32 %v369_v48, %v361_v47 }
 0x495   :  { %2442 = vtanh.f32 %v371_v49 }
 0x49f   :  { %v2443_v56 = vpop.eup %2442 }
 0x4a0   :  { %374 = vrot.lane.b32.xlu0 %v2443_v56, %s2559_s17 }
 0x512   :  { %v375_v57 = vpop.permute.xlu0 %374 }
 0x513   :  { %v377_v58 = vmul.f32 %v2441_v44, %v375_v57 }
 0x515   :  { %379 = vrot.lane.b32.xlu1 %v377_v58, %s2560_s3 }
 0x587   :  { %v380_v2 = vpop.permute.xlu1 %379 }
 0x588   :  { %382 = vst.msk [vmem:[#allocation2 + $0x8] sm:$0xff] %vm177_vm2, %v380_v2  ;;  %2149 = vmatmul.mubr.msk.f32.vlgmr.msra.gmra.mrb[8].mxu0 %vm177_vm2, %v380_v2 }
 0x589   :  { %2344 = vmatpush3.bf16.msra.mxu0 %v2620_v8  ;;  %2170 = vmatprep.mubr.msk.f32.mxu0 %vm2557_vm1, %v2558_v4 }
 0x58a   :  { %2345 = vmatprep.subr.bf16.mxu0 %v2556_v0 }
 0x58d   :  { %2347 = vmatpush3.bf16.msra.mxu0 %v2633_v12 }
 0x58e   :  { %2354 = vmatprep.subr.bf16.mxu0 %v2556_v0 }
 0x65b   :  { %v451_v5 = vpop.f32.mrb[8].mxu0 }
 0x65c   :  { %v455_v6 = vadd.f32 %v451_v5, %v149_v3  ;;  %v2150_v7 = vpop.f32.mrb[9].mxu0  ;;  %v164_v5 = vadd.f32 %v2700_v61, %v2654_v13 }
 0x65e   :  { %2444 = vtanh.f32 %v455_v6  ;;  %v456_v10 = vsub.f32 0.0, %v455_v6 }
 0x660   :  { %v457_v11 = vmul.f32 1.442695, %v456_v10 }
 0x662   :  { %2446 = vpow2.f32 %v457_v11 }
 0x668   :  { %v2445_v9 = vpop.eup %2444 }
 0x669   :  { %465 = vrot.lane.b32.xlu0 %v2445_v9, %s2559_s17 }
 0x66c   :  { %v2447_v14 = vpop.eup %2446 }
 0x66d   :  { %v459_v15 = vadd.f32 1.0, %v2447_v14 }
 0x66f   :  { %2448 = vrcp.f32 %v459_v15 }
 0x679   :  { %v2449_v16 = vpop.eup %2448 }
 0x67a   :  { %v463_v19 = vmul.f32 %v2449_v16, %v371_v49 }
 0x6db   :  { %v466_v17 = vpop.permute.xlu0 %465 }
 0x6dc   :  { %v468_v18 = vmul.f32 %v2449_v16, %v466_v17 }
 0x6de   :  { %470 = vrot.lane.b32.xlu1 %v468_v18, %s2560_s3 }
 0x750   :  { %v471_v20 = vpop.permute.xlu1 %470 }
 0x751   :  { %v473_v21 = vadd.f32 %v471_v20, %v463_v19  ;;  %v1010_v20 = vld [vmem:[%s2963_s4] sm:$0xff] }
 0x753   :  { %2450 = vtanh.f32 %v473_v21 }
 0x75d   :  { %v2451_v22 = vpop.eup %2450 }
 0x75e   :  { %476 = vrot.lane.b32.xlu0 %v2451_v22, %s2559_s17 }
 0x7d0   :  { %v477_v23 = vpop.permute.xlu0 %476 }
 0x7d1   :  { %v479_v24 = vmul.f32 %v2449_v16, %v477_v23 }
 0x7d3   :  { %481 = vrot.lane.b32.xlu1 %v479_v24, %s2560_s3 }
 0x845   :  { %v482_v25 = vpop.permute.xlu1 %481 }
 0x846   :  { %484 = vst.msk [vmem:[#allocation2 + $0x10] sm:$0xff] %vm177_vm2, %v482_v25  ;;  %2160 = vmatmul.mubr.msk.f32.vlgmr.msra.gmra.mrb[4].mxu1 %vm177_vm2, %v482_v25 }
 0x847   :  { %2350 = vmatpush3.bf16.msra.mxu1 %v2620_v8  ;;  %2181 = vmatprep.mubr.msk.f32.mxu1 %vm2557_vm1, %v2558_v4 }
 0x848   :  { %2351 = vmatprep.subr.bf16.mxu1 %v2556_v0 }
 0x84b   :  { %2353 = vmatpush3.bf16.msra.mxu1 %v2633_v12 }
 0x84c   :  { %2360 = vmatprep.subr.bf16.mxu1 %v2556_v0 }
 0x919   :  { %v553_v27 = vpop.f32.mrb[4].mxu1 }
 0x91a   :  { %v557_v28 = vadd.f32 %v553_v27, %v154_v26  ;;  %v2161_v29 = vpop.f32.mrb[5].mxu1  ;;  %v1012_v26 = vld [vmem:[%s2963_s4 + $0x10] sm:$0xff]  ;;  %v1013_v27 = vld [vmem:[%s2963_s4 + $0x18] sm:$0xff] }
 0x91c   :  { %2452 = vtanh.f32 %v557_v28  ;;  %v558_v31 = vsub.f32 0.0, %v557_v28  ;;  %v2370_v28 = vpack.c.bf16 %v1013_v27, %v1012_v26 }
 0x91e   :  { %v559_v32 = vmul.f32 1.442695, %v558_v31  ;;  %v1003_v31 = vld [vmem:[#allocation2 + $0x8] sm:$0xff] }
 0x920   :  { %2454 = vpow2.f32 %v559_v32  ;;  %v1004_v32 = vld [vmem:[#allocation2 + $0x10] sm:$0xff] }
 0x926   :  { %v2453_v30 = vpop.eup %2452 }
 0x927   :  { %567 = vrot.lane.b32.xlu0 %v2453_v30, %s2559_s17  ;;  %v1002_v30 = vld [vmem:[#allocation2] sm:$0xff] }
 0x92a   :  { %v2455_v33 = vpop.eup %2454 }
 0x92b   :  { %v561_v34 = vadd.f32 1.0, %v2455_v33 }
 0x92d   :  { %2456 = vrcp.f32 %v561_v34 }
 0x937   :  { %v2457_v35 = vpop.eup %2456 }
 0x938   :  { %v565_v38 = vmul.f32 %v2457_v35, %v473_v21  ;;  %v1011_v21 = vld [vmem:[%s2963_s4 + $0x8] sm:$0xff] }
 0x939   :  { %v2366_v22 = vpack.c.bf16 %v1011_v21, %v1010_v20 }
 0x999   :  { %v568_v36 = vpop.permute.xlu0 %567 }
 0x99a   :  { %v570_v37 = vmul.f32 %v2457_v35, %v568_v36  ;;  %v169_v36 = vadd.f32 %v2654_v13, %v2706_v1 }
 0x99c   :  { %572 = vrot.lane.b32.xlu1 %v570_v37, %s2560_s3 }
 0xa0e   :  { %v573_v39 = vpop.permute.xlu1 %572 }
 0xa0f   :  { %v575_v40 = vadd.f32 %v573_v39, %v565_v38 }
 0xa11   :  { %2458 = vtanh.f32 %v575_v40 }
 0xa1b   :  { %v2459_v41 = vpop.eup %2458 }
 0xa1c   :  { %578 = vrot.lane.b32.xlu0 %v2459_v41, %s2559_s17 }
 0xa8e   :  { %v579_v42 = vpop.permute.xlu0 %578 }
 0xa8f   :  { %v581_v43 = vmul.f32 %v2457_v35, %v579_v42 }
 0xa91   :  { %583 = vrot.lane.b32.xlu1 %v581_v43, %s2560_s3 }
 0xb03   :  { %v584_v44 = vpop.permute.xlu1 %583 }
 0xb04   :  { %586 = vst.msk [vmem:[#allocation2 + $0x18] sm:$0xff] %vm177_vm2, %v584_v44  ;;  %2171 = vmatmul.mubr.msk.f32.vlgmr.msra.gmra.mrb[10].mxu0 %vm177_vm2, %v584_v44 }
 0xb05   :  { %2356 = vmatpush3.bf16.msra.mxu0 %v2620_v8  ;;  %2192 = vmatprep.mubr.msk.f32.mxu0 %vm2557_vm1, %v2558_v4 }
 0xb06   :  { %2357 = vmatprep.subr.bf16.mxu0 %v2556_v0 }
 0xb09   :  { %2359 = vmatpush3.bf16.msra.mxu0 %v2633_v12 }
 0xb0a   :  { %2367 = vmatprep.subr.bf16.mxu0 %v2366_v22 }
 0xb0b   :  { %v1005_v33 = vld [vmem:[#allocation2 + $0x18] sm:$0xff] }
 0xbd7   :  { %v655_v46 = vpop.f32.mrb[10].mxu0 }
 0xbd8   :  { %v659_v47 = vadd.f32 %v655_v46, %v159_v45  ;;  %v2172_v48 = vpop.f32.mrb[11].mxu0 }
 0xbda   :  { %2460 = vtanh.f32 %v659_v47  ;;  %v660_v50 = vsub.f32 0.0, %v659_v47 }
 0xbdc   :  { %v661_v51 = vmul.f32 1.442695, %v660_v50 }
 0xbde   :  { %2462 = vpow2.f32 %v661_v51 }
 0xbe4   :  { %v2461_v49 = vpop.eup %2460 }
 0xbe5   :  { %669 = vrot.lane.b32.xlu0 %v2461_v49, %s2559_s17 }
 0xbe8   :  { %v2463_v52 = vpop.eup %2462 }
 0xbe9   :  { %v663_v53 = vadd.f32 1.0, %v2463_v52 }
 0xbeb   :  { %2464 = vrcp.f32 %v663_v53 }
 0xbf5   :  { %v2465_v54 = vpop.eup %2464 }
 0xbf6   :  { %v667_v57 = vmul.f32 %v2465_v54, %v575_v40 }
 0xc57   :  { %v670_v55 = vpop.permute.xlu0 %669 }
 0xc58   :  { %v672_v56 = vmul.f32 %v2465_v54, %v670_v55 }
 0xc5a   :  { %674 = vrot.lane.b32.xlu1 %v672_v56, %s2560_s3 }
 0xccc   :  { %v675_v58 = vpop.permute.xlu1 %674 }
 0xccd   :  { %v677_v59 = vadd.f32 %v675_v58, %v667_v57  ;;  %v1014_v57 = vld [vmem:[%s2964_s5] sm:$0xff]  ;;  %v1015_v58 = vld [vmem:[%s2964_s5 + $0x8] sm:$0xff] }
 0xccf   :  { %2466 = vtanh.f32 %v677_v59 }
 0xcd9   :  { %v2467_v60 = vpop.eup %2466 }
 0xcda   :  { %680 = vrot.lane.b32.xlu0 %v2467_v60, %s2559_s17  ;;  %v1016_v60 = vld [vmem:[%s2964_s5 + $0x10] sm:$0xff] }
 0xd4c   :  { %v681_v62 = vpop.permute.xlu0 %680 }
 0xd4d   :  { %v683_v2 = vmul.f32 %v2465_v54, %v681_v62  ;;  %v1017_v62 = vld [vmem:[%s2964_s5 + $0x18] sm:$0xff] }
 0xd4f   :  { %685 = vrot.lane.b32.xlu1 %v683_v2, %s2560_s3  ;;  %v2816_v2 = vpack.c.bf16 %v1017_v62, %v1016_v60 }
 0xdc1   :  { %v686_v3 = vpop.permute.xlu1 %685 }
 0xdc2   :  { %688 = vst.msk [vmem:[#allocation2 + $0x20] sm:$0xff] %vm177_vm2, %v686_v3  ;;  %2182 = vmatmul.mubr.msk.f32.vlgmr.msra.gmra.mrb[6].mxu1 %vm177_vm2, %v686_v3 }
 0xdc3   :  { %2362 = vmatpush3.bf16.msra.mxu1 %v2620_v8  ;;  %2203 = vmatprep.mubr.msk.f32.mxu1 %vm2557_vm1, %v2558_v4 }
 0xdc4   :  { %2363 = vmatprep.subr.bf16.mxu1 %v2556_v0 }
 0xdc7   :  { %2365 = vmatpush3.bf16.msra.mxu1 %v2633_v12 }
 0xdc8   :  { %2374 = vmatprep.subr.bf16.mxu1 %v2556_v0 }
 0xdc9   :  { %v1006_v34 = vld [vmem:[#allocation2 + $0x20] sm:$0xff] }
 0xe95   :  { %v757_v6 = vpop.f32.mrb[6].mxu1 }
 0xe96   :  { %v761_v7 = vadd.f32 %v757_v6, %v164_v5  ;;  %v2183_v9 = vpop.f32.mrb[7].mxu1 }
 0xe97   :  { %v174_v9 = vadd.f32 %v2704_v63, %v2654_v13 }
 0xe98   :  { %2468 = vtanh.f32 %v761_v7  ;;  %v762_v8 = vsub.f32 0.0, %v761_v7 }
 0xe9a   :  { %v763_v11 = vmul.f32 1.442695, %v762_v8 }
 0xe9c   :  { %2470 = vpow2.f32 %v763_v11 }
 0xea2   :  { %v2469_v10 = vpop.eup %2468 }
 0xea3   :  { %771 = vrot.lane.b32.xlu0 %v2469_v10, %s2559_s17 }
 0xea6   :  { %v2471_v14 = vpop.eup %2470 }
 0xea7   :  { %v765_v15 = vadd.f32 1.0, %v2471_v14  ;;  %v2842_v14 = vld [vmem:[%s2965_s6] ss:$0 sm:$0xff] }
 0xea9   :  { %2472 = vrcp.f32 %v765_v15 }
 0xeb3   :  { %v2473_v16 = vpop.eup %2472 }
 0xeb4   :  { %v769_v18 = vmul.f32 %v2473_v16, %v677_v59  ;;  %v2806_v59 = vpack.c.bf16 %v1015_v58, %v1014_v57 }
 0xf15   :  { %v772_v12 = vpop.permute.xlu0 %771 }
 0xf16   :  { %v774_v17 = vmul.f32 %v2473_v16, %v772_v12 }
 0xf18   :  { %776 = vrot.lane.b32.xlu1 %v774_v17, %s2560_s3 }
 0xf8a   :  { %v777_v61 = vpop.permute.xlu1 %776 }
 0xf8b   :  { %v779_v19 = vadd.f32 %v777_v61, %v769_v18 }
 0xf8d   :  { %2474 = vtanh.f32 %v779_v19 }
 0xf97   :  { %v2475_v23 = vpop.eup %2474 }
 0xf98   :  { %782 = vrot.lane.b32.xlu0 %v2475_v23, %s2559_s17 }
0x100a   :  { %v783_v24 = vpop.permute.xlu0 %782 }
0x100b   :  { %v785_v25 = vmul.f32 %v2473_v16, %v783_v24 }
0x100d   :  { %787 = vrot.lane.b32.xlu1 %v785_v25, %s2560_s3 }
0x107f   :  { %v788_v29 = vpop.permute.xlu1 %787 }
0x1080   :  { %790 = vst.msk [vmem:[#allocation2 + $0x28] sm:$0xff] %vm177_vm2, %v788_v29  ;;  %2193 = vmatmul.mubr.msk.f32.vlgmr.msra.gmra.mrb[12].mxu0 %vm177_vm2, %v788_v29 }
0x1081   :  { %2369 = vmatpush3.bf16.msra.mxu0 %v2366_v22  ;;  %2214 = vmatprep.mubr.msk.f32.mxu0 %vm177_vm2, %v1002_v30 }
0x1082   :  { %2371 = vmatprep.subr.bf16.mxu0 %v2370_v28 }
0x1085   :  { %2373 = vmatpush3.bf16.msra.mxu0 %v2370_v28 }
0x1086   :  { %2386 = vmatprep.subr.bf16.mxu0 %v2556_v0 }
0x1087   :  { %v1007_v35 = vld [vmem:[#allocation2 + $0x28] sm:$0xff] }
0x1088   :  { %2215 = vmatmul.mubr.msk.f32.vlgmr.msra.gmra.mrb[14].mxu0 %vm177_vm2, %v1003_v31 }
0x1089   :  { %2217 = vmatprep.mubr.msk.f32.mxu0 %vm177_vm2, %v1004_v32  ;;  %2388 = vmatpush3.bf16.msra.mxu0 %v2806_v59 }
0x108a   :  { %2389 = vmatprep.subr.bf16.mxu0 %v2556_v0 }
0x108c   :  { %2218 = vmatmul.mubr.msk.f32.gmra.mrb[16].mxu0 %vm177_vm2, %v1005_v33 }
0x108d   :  { %2220 = vmatprep.mubr.msk.f32.mxu0 %vm177_vm2, %v1006_v34  ;;  %2391 = vmatpush3.bf16.msra.mxu0 %v2816_v2 }
0x108e   :  { %2398 = vmatprep.subr.bf16.mxu0 %v2556_v0 }
0x1090   :  { %2221 = vmatmul.mubr.msk.f32.gmra.mrb[18].mxu0 %vm177_vm2, %v1007_v35 }
0x1153   :  { %v859_v37 = vpop.f32.mrb[12].mxu0 }
0x1154   :  { %v863_v38 = vadd.f32 %v859_v37, %v169_v36  ;;  %v2194_v39 = vpop.f32.mrb[13].mxu0 }
0x1156   :  { %2476 = vtanh.f32 %v863_v38  ;;  %v864_v47 = vsub.f32 0.0, %v863_v38 }
0x1158   :  { %v865_v1 = vmul.f32 1.442695, %v864_v47 }
0x115a   :  { %2478 = vpow2.f32 %v865_v1 }
0x115b   :  { %v2784_v40 = vpop.f32.mrb[14].mxu0 }
0x115c   :  { %v1115_v41 = vpop.f32.mrb[15].mxu0 }
0x115d   :  { %v1116_v15 = vadd.f32 %v2842_v14, %v1115_v41 }
0x115f   :  { %v2786_v42 = vpop.f32.mrb[16].mxu0 }
0x1160   :  { %v2477_v43 = vpop.eup %2476  ;;  %v2788_v44 = vpop.f32.mrb[17].mxu0 }
0x1161   :  { %873 = vrot.lane.b32.xlu0 %v2477_v43, %s2559_s17 }
0x1163   :  { %v2791_v45 = vpop.f32.mrb[18].mxu0 }
0x1164   :  { %v2793_v46 = vpop.f32.mrb[19].mxu0  ;;  %v2479_v48 = vpop.eup %2478 }
0x1165   :  { %v867_v49 = vadd.f32 1.0, %v2479_v48  ;;  %v1121_v48 = vadd.f32 %v2784_v40, %v2842_v14 }
0x1167   :  { %2480 = vrcp.f32 %v867_v49 }
0x1171   :  { %v2481_v50 = vpop.eup %2480 }
0x1172   :  { %v871_v53 = vmul.f32 %v2481_v50, %v779_v19 }
0x11d3   :  { %v874_v51 = vpop.permute.xlu0 %873 }
0x11d4   :  { %v876_v52 = vmul.f32 %v2481_v50, %v874_v51 }
0x11d6   :  { %878 = vrot.lane.b32.xlu1 %v876_v52, %s2560_s3 }
0x1248   :  { %v879_v54 = vpop.permute.xlu1 %878 }
0x1249   :  { %v2796_v55 = vadd.f32 %v879_v54, %v871_v53 }
0x124b   :  { %2482 = vtanh.f32 %v2796_v55 }
0x1255   :  { %v2483_v56 = vpop.eup %2482 }
0x1256   :  { %884 = vrot.lane.b32.xlu0 %v2483_v56, %s2559_s17 }
0x12c8   :  { %v885_v3 = vpop.permute.xlu0 %884 }
0x12c9   :  { %v887_v5 = vmul.f32 %v2481_v50, %v885_v3 }
0x12cb   :  { %889 = vrot.lane.b32.xlu1 %v887_v5, %s2560_s3 }
0x133d   :  { %v890_v6 = vpop.permute.xlu1 %889 }
0x133e   :  { %892 = vst.msk [vmem:[#allocation2 + $0x30] sm:$0xff] %vm177_vm2, %v890_v6  ;;  %2204 = vmatmul.mubr.msk.f32.vlgmr.msra.gmra.mrb[8].mxu1 %vm177_vm2, %v890_v6 }
0x133f   :  { %2376 = vmatpush3.bf16.msra.mxu1 %v2806_v59  ;;  %2234 = vmatprep.mubr.msk.f32.mxu1 %vm2557_vm1, %v2558_v4 }
0x1340   :  { %2377 = vmatprep.subr.bf16.mxu1 %v2556_v0 }
0x1343   :  { %2379 = vmatpush3.bf16.msra.mxu1 %v2816_v2 }
0x1344   :  { %2380 = vmatprep.subr.bf16.mxu1 %v2556_v0 }
0x1345   :  { %v1008_v7 = vld [vmem:[#allocation2 + $0x30] sm:$0xff] }
0x1346   :  { %2235 = vmatmul.mubr.f32.vlgmr.msra.gmra.mrb[10].mxu1 %v2558_v4  ;;  %2223 = vmatprep.mubr.msk.f32.mxu0 %vm177_vm2, %v1008_v7 }
0x1347   :  { %2382 = vmatpush3.bf16.msra.mxu1 %v2806_v59  ;;  %2245 = vmatprep.mubr.msk.f32.mxu1 %vm2557_vm1, %v2558_v4 }
0x1348   :  { %2383 = vmatprep.subr.bf16.mxu1 %v2556_v0 }
0x134b   :  { %2385 = vmatpush3.bf16.msra.mxu1 %v2816_v2 }
0x134c   :  { %2392 = vmatprep.subr.bf16.mxu1 %v2556_v0 }
0x1411   :  { %v961_v10 = vpop.f32.mrb[8].mxu1 }
0x1412   :  { %v965_v8 = vadd.f32 %v961_v10, %v174_v9  ;;  %v2205_v11 = vpop.f32.mrb[9].mxu1 }
0x1414   :  { %v966_v28 = vsub.f32 0.0, %v965_v8 }
0x1416   :  { %v967_v29 = vmul.f32 1.442695, %v966_v28 }
0x1419   :  { %v1220_v16 = vpop.f32.mrb[10].mxu1 }
0x141a   :  { %v1224_v12 = vadd.f32 %v1220_v16, %v1116_v15  ;;  %v2236_v17 = vpop.f32.mrb[11].mxu1  ;;  %v1126_v16 = vadd.f32 %v2842_v14, %v2788_v44 }
0x141c   :  { %2484 = vtanh.f32 %v1224_v12  ;;  %v1225_v61 = vsub.f32 0.0, %v1224_v12 }
0x141e   :  { %v1226_v19 = vmul.f32 1.442695, %v1225_v61 }
0x1420   :  { %2486 = vpow2.f32 %v1226_v19 }
0x1426   :  { %v2485_v18 = vpop.eup %2484 }
0x1427   :  { %1234 = vrot.lane.b32.xlu0 %v2485_v18, %s2559_s17 }
0x142a   :  { %v2487_v13 = vpop.eup %2486 }
0x142b   :  { %v1228_v63 = vadd.f32 1.0, %v2487_v13 }
0x142d   :  { %2488 = vrcp.f32 %v1228_v63 }
0x1437   :  { %v2489_v20 = vpop.eup %2488 }
0x1438   :  { %v1232_v23 = vmul.f32 0.0, %v2489_v20 }
0x1499   :  { %v1235_v21 = vpop.permute.xlu0 %1234 }
0x149a   :  { %v1237_v22 = vmul.f32 %v2489_v20, %v1235_v21 }
0x149c   :  { %1239 = vrot.lane.b32.xlu1 %v1237_v22, %s2560_s3 }
0x150e   :  { %v1240_v24 = vpop.permute.xlu1 %1239 }
0x150f   :  { %v1242_v25 = vadd.f32 %v1240_v24, %v1232_v23 }
0x1511   :  { %2490 = vtanh.f32 %v1242_v25 }
0x1512   :  { %2492 = vtanh.f32 %v965_v8 }
0x1513   :  { %2494 = vpow2.f32 %v967_v29 }
0x151b   :  { %v2491_v26 = vpop.eup %2490 }
0x151c   :  { %1245 = vrot.lane.b32.xlu0 %v2491_v26, %s2559_s17  ;;  %v2493_v27 = vpop.eup %2492 }
0x151d   :  { %v2495_v30 = vpop.eup %2494 }
0x151e   :  { %v969_v31 = vadd.f32 1.0, %v2495_v30  ;;  %v1131_v30 = vadd.f32 %v2786_v42, %v2842_v14 }
0x1520   :  { %975 = vrot.lane.b32.xlu0 %v2493_v27, %s2559_s17  ;;  %2496 = vrcp.f32 %v969_v31 }
0x152a   :  { %v2497_v34 = vpop.eup %2496 }
0x152b   :  { %v973_v38 = vmul.f32 %v2497_v34, %v2796_v55 }
0x158e   :  { %v1246_v32 = vpop.permute.xlu0 %1245 }
0x158f   :  { %v1248_v33 = vmul.f32 %v2489_v20, %v1246_v32 }
0x1591   :  { %1250 = vrot.lane.b32.xlu1 %v1248_v33, %s2560_s3 }
0x1592   :  { %v976_v35 = vpop.permute.xlu0 %975 }
0x1593   :  { %v978_v36 = vmul.f32 %v2497_v34, %v976_v35 }
0x1595   :  { %980 = vrot.lane.b32.xlu0 %v978_v36, %s2560_s3 }
0x1603   :  { %v1251_v37 = vpop.permute.xlu1 %1250 }
0x1604   :  { %2246 = vmatmul.mubr.msk.f32.vlgmr.msra.gmra.mrb[12].mxu1 %vm177_vm2, %v1251_v37 }
0x1605   :  { %2394 = vmatpush3.bf16.msra.mxu1 %v2806_v59  ;;  %2267 = vmatprep.mubr.msk.f32.mxu1 %vm2557_vm1, %v2558_v4 }
0x1606   :  { %2395 = vmatprep.subr.bf16.mxu1 %v2556_v0 }
0x1607   :  { %v981_v39 = vpop.permute.xlu0 %980 }
0x1608   :  { %v2857_v41 = vadd.f32 %v981_v39, %v973_v38 }
0x1609   :  { %2397 = vmatpush3.bf16.msra.mxu1 %v2816_v2 }
0x160a   :  { %2498 = vtanh.f32 %v2857_v41  ;;  %2404 = vmatprep.subr.bf16.mxu1 %v2556_v0 }
0x1614   :  { %v2499_v43 = vpop.eup %2498 }
0x1615   :  { %986 = vrot.lane.b32.xlu0 %v2499_v43, %s2559_s17 }
0x1687   :  { %v987_v47 = vpop.permute.xlu0 %986 }
0x1688   :  { %v989_v1 = vmul.f32 %v2497_v34, %v987_v47 }
0x168a   :  { %991 = vrot.lane.b32.xlu0 %v989_v1, %s2560_s3 }
0x16d7   :  { %v1320_v49 = vpop.f32.mrb[12].mxu1 }
0x16d8   :  { %v1324_v50 = vadd.f32 %v1320_v49, %v1121_v48  ;;  %v2247_v51 = vpop.f32.mrb[13].mxu1 }
0x16da   :  { %2500 = vtanh.f32 %v1324_v50  ;;  %v1325_v40 = vsub.f32 0.0, %v1324_v50 }
0x16dc   :  { %v1326_v55 = vmul.f32 1.442695, %v1325_v40 }
0x16de   :  { %2502 = vpow2.f32 %v1326_v55 }
0x16e4   :  { %v2501_v52 = vpop.eup %2500 }
0x16e5   :  { %1334 = vrot.lane.b32.xlu1 %v2501_v52, %s2559_s17 }
0x16e8   :  { %v2503_v56 = vpop.eup %2502 }
0x16e9   :  { %v1328_v57 = vadd.f32 1.0, %v2503_v56 }
0x16eb   :  { %2504 = vrcp.f32 %v1328_v57 }
0x16f5   :  { %v2505_v58 = vpop.eup %2504 }
0x16f6   :  { %v1332_v3 = vmul.f32 %v2505_v58, %v1242_v25 }
0x16fc   :  { %v992_v53 = vpop.permute.xlu0 %991 }
0x16fd   :  { %994 = vst.msk [vmem:[#allocation2 + $0x38] sm:$0xff] %vm177_vm2, %v992_v53  ;;  %995 = vst.msk [vmem:[%s2966_s7] sm:$0xff] %vm177_vm2, %v992_v53  ;;  %v1136_v53 = vadd.f32 %v2842_v14, %v2793_v46 }
0x1704   :  { %v1009_v54 = vld [vmem:[#allocation2 + $0x38] sm:$0xff] }
0x1705   :  { %2224 = vmatmul.mubr.msk.f32.gmra.mrb[20].mxu0 %vm177_vm2, %v1009_v54 }
0x1706   :  { %2256 = vmatprep.mubr.msk.f32.mxu0 %vm2557_vm1, %v2558_v4 }
0x1757   :  { %v1335_v60 = vpop.permute.xlu1 %1334 }
0x1758   :  { %v1337_v62 = vmul.f32 %v2505_v58, %v1335_v60 }
0x175a   :  { %1339 = vrot.lane.b32.xlu1 %v1337_v62, %s2560_s3 }
0x17cc   :  { %v1340_v5 = vpop.permute.xlu1 %1339 }
0x17cd   :  { %v1342_v6 = vadd.f32 %v1340_v5, %v1332_v3 }
0x17cf   :  { %2506 = vtanh.f32 %v1342_v6 }
0x17d8   :  { %v2876_v7 = vpop.f32.mrb[20].mxu0 }
0x17d9   :  { %v2507_v9 = vpop.eup %2506  ;;  %v2878_v10 = vpop.f32.mrb[21].mxu0 }
0x17da   :  { %1345 = vrot.lane.b32.xlu1 %v2507_v9, %s2559_s17 }
0x184c   :  { %v1346_v8 = vpop.permute.xlu1 %1345 }
0x184d   :  { %v1348_v11 = vmul.f32 %v2505_v58, %v1346_v8 }
0x184f   :  { %1350 = vrot.lane.b32.xlu1 %v1348_v11, %s2560_s3 }
0x18c1   :  { %v1351_v15 = vpop.permute.xlu1 %1350 }
0x18c2   :  { %2257 = vmatmul.mubr.msk.f32.vlgmr.msra.gmra.mrb[22].mxu0 %vm177_vm2, %v1351_v15 }
0x18c3   :  { %2400 = vmatpush3.bf16.msra.mxu0 %v2806_v59  ;;  %2278 = vmatprep.mubr.msk.f32.mxu0 %vm2557_vm1, %v2558_v4 }
0x18c4   :  { %2401 = vmatprep.subr.bf16.mxu0 %v2556_v0 }
0x18c7   :  { %2403 = vmatpush3.bf16.msra.mxu0 %v2816_v2 }
0x18c8   :  { %2410 = vmatprep.subr.bf16.mxu0 %v2556_v0 }
0x1995   :  { %v1420_v12 = vpop.f32.mrb[22].mxu0 }
0x1996   :  { %v1424_v17 = vadd.f32 %v1420_v12, %v1126_v16  ;;  %v2258_v18 = vpop.f32.mrb[23].mxu0 }
0x1998   :  { %2508 = vtanh.f32 %v1424_v17  ;;  %v1425_v19 = vsub.f32 0.0, %v1424_v17  ;;  %v1141_v17 = vadd.f32 %v2791_v45, %v2842_v14 }
0x199a   :  { %v1426_v13 = vmul.f32 1.442695, %v1425_v19 }
0x199c   :  { %2510 = vpow2.f32 %v1426_v13 }
0x19a2   :  { %v2509_v61 = vpop.eup %2508 }
0x19a3   :  { %1434 = vrot.lane.b32.xlu0 %v2509_v61, %s2559_s17 }
0x19a6   :  { %v2511_v63 = vpop.eup %2510 }
0x19a7   :  { %v1428_v20 = vadd.f32 1.0, %v2511_v63 }
0x19a9   :  { %2512 = vrcp.f32 %v1428_v20 }
0x19b3   :  { %v2513_v21 = vpop.eup %2512 }
0x19b4   :  { %v1432_v24 = vmul.f32 %v2513_v21, %v1342_v6 }
0x1a15   :  { %v1435_v22 = vpop.permute.xlu0 %1434 }
0x1a16   :  { %v1437_v23 = vmul.f32 %v2513_v21, %v1435_v22 }
0x1a18   :  { %1439 = vrot.lane.b32.xlu1 %v1437_v23, %s2560_s3 }
0x1a8a   :  { %v1440_v44 = vpop.permute.xlu1 %1439 }
0x1a8b   :  { %v1442_v25 = vadd.f32 %v1440_v44, %v1432_v24 }
0x1a8d   :  { %2514 = vtanh.f32 %v1442_v25 }
0x1a97   :  { %v2515_v26 = vpop.eup %2514 }
0x1a98   :  { %1445 = vrot.lane.b32.xlu0 %v2515_v26, %s2559_s17 }
0x1b0a   :  { %v1446_v27 = vpop.permute.xlu0 %1445 }
0x1b0b   :  { %v1448_v28 = vmul.f32 %v2513_v21, %v1446_v27  ;;  %v1146_v27 = vadd.f32 %v2842_v14, %v2878_v10 }
0x1b0d   :  { %1450 = vrot.lane.b32.xlu1 %v1448_v28, %s2560_s3 }
0x1b7f   :  { %v1451_v29 = vpop.permute.xlu1 %1450 }
0x1b80   :  { %2268 = vmatmul.mubr.msk.f32.vlgmr.msra.gmra.mrb[14].mxu1 %vm177_vm2, %v1451_v29 }
0x1b81   :  { %2406 = vmatpush3.bf16.msra.mxu1 %v2806_v59  ;;  %2289 = vmatprep.mubr.msk.f32.mxu1 %vm2557_vm1, %v2558_v4 }
0x1b82   :  { %2407 = vmatprep.subr.bf16.mxu1 %v2556_v0 }
0x1b85   :  { %2409 = vmatpush3.bf16.msra.mxu1 %v2816_v2 }
0x1b86   :  { %2416 = vmatprep.subr.bf16.mxu1 %v2556_v0 }
0x1c53   :  { %v1520_v31 = vpop.f32.mrb[14].mxu1 }
0x1c54   :  { %v1524_v32 = vadd.f32 %v1520_v31, %v1131_v30  ;;  %v2269_v33 = vpop.f32.mrb[15].mxu1 }
0x1c56   :  { %2516 = vtanh.f32 %v1524_v32  ;;  %v1525_v35 = vsub.f32 0.0, %v1524_v32 }
0x1c58   :  { %v1526_v36 = vmul.f32 1.442695, %v1525_v35 }
0x1c5a   :  { %2518 = vpow2.f32 %v1526_v36 }
0x1c60   :  { %v2517_v34 = vpop.eup %2516 }
0x1c61   :  { %1534 = vrot.lane.b32.xlu0 %v2517_v34, %s2559_s17 }
0x1c64   :  { %v2519_v37 = vpop.eup %2518 }
0x1c65   :  { %v1528_v38 = vadd.f32 1.0, %v2519_v37 }
0x1c67   :  { %2520 = vrcp.f32 %v1528_v38 }
0x1c71   :  { %v2521_v39 = vpop.eup %2520 }
0x1c72   :  { %v1532_v1 = vmul.f32 %v2521_v39, %v1442_v25 }
0x1cd3   :  { %v1535_v43 = vpop.permute.xlu0 %1534 }
0x1cd4   :  { %v1537_v47 = vmul.f32 %v2521_v39, %v1535_v43 }
0x1cd6   :  { %1539 = vrot.lane.b32.xlu1 %v1537_v47, %s2560_s3 }
0x1d48   :  { %v1540_v42 = vpop.permute.xlu1 %1539 }
0x1d49   :  { %v1542_v48 = vadd.f32 %v1540_v42, %v1532_v1 }
0x1d4b   :  { %2522 = vtanh.f32 %v1542_v48 }
0x1d55   :  { %v2523_v49 = vpop.eup %2522 }
0x1d56   :  { %1545 = vrot.lane.b32.xlu0 %v2523_v49, %s2559_s17  ;;  %v1151_v49 = vadd.f32 %v2876_v7, %v2842_v14 }
0x1dc8   :  { %v1546_v50 = vpop.permute.xlu0 %1545 }
0x1dc9   :  { %v1548_v51 = vmul.f32 %v2521_v39, %v1546_v50 }
0x1dcb   :  { %1550 = vrot.lane.b32.xlu1 %v1548_v51, %s2560_s3 }
0x1e3d   :  { %v1551_v52 = vpop.permute.xlu1 %1550 }
0x1e3e   :  { %2279 = vmatmul.mubr.msk.f32.vlgmr.msra.gmra.mrb[24].mxu0 %vm177_vm2, %v1551_v52 }
0x1e3f   :  { %2412 = vmatpush3.bf16.msra.mxu0 %v2806_v59  ;;  %2300 = vmatprep.mubr.msk.f32.mxu0 %vm2557_vm1, %v2558_v4 }
0x1e40   :  { %2413 = vmatprep.subr.bf16.mxu0 %v2556_v0 }
0x1e43   :  { %2415 = vmatpush3.bf16.msra.mxu0 %v2816_v2 }
0x1f11   :  { %v1620_v54 = vpop.f32.mrb[24].mxu0 }
0x1f12   :  { %v1624_v40 = vadd.f32 %v1620_v54, %v1136_v53  ;;  %v2280_v55 = vpop.f32.mrb[25].mxu0 }
0x1f14   :  { %2524 = vtanh.f32 %v1624_v40  ;;  %v1625_v57 = vsub.f32 0.0, %v1624_v40 }
0x1f16   :  { %v1626_v58 = vmul.f32 1.442695, %v1625_v57 }
0x1f18   :  { %2526 = vpow2.f32 %v1626_v58 }
0x1f1e   :  { %v2525_v56 = vpop.eup %2524 }
0x1f1f   :  { %1634 = vrot.lane.b32.xlu0 %v2525_v56, %s2559_s17 }
0x1f22   :  { %v2527_v60 = vpop.eup %2526 }
0x1f23   :  { %v1628_v62 = vadd.f32 1.0, %v2527_v60 }
0x1f25   :  { %2528 = vrcp.f32 %v1628_v62 }
0x1f2f   :  { %v2529_v3 = vpop.eup %2528 }
0x1f30   :  { %v1632_v9 = vmul.f32 %v2529_v3, %v1542_v48 }
0x1f91   :  { %v1635_v5 = vpop.permute.xlu0 %1634 }
0x1f92   :  { %v1637_v6 = vmul.f32 %v2529_v3, %v1635_v5 }
0x1f94   :  { %1639 = vrot.lane.b32.xlu1 %v1637_v6, %s2560_s3 }
0x2006   :  { %v1640_v46 = vpop.permute.xlu1 %1639 }
0x2007   :  { %v1642_v8 = vadd.f32 %v1640_v46, %v1632_v9 }
0x2009   :  { %2530 = vtanh.f32 %v1642_v8 }
0x2013   :  { %v2531_v11 = vpop.eup %2530 }
0x2014   :  { %1645 = vrot.lane.b32.xlu0 %v2531_v11, %s2559_s17 }
0x2086   :  { %v1646_v15 = vpop.permute.xlu0 %1645 }
0x2087   :  { %v1648_v16 = vmul.f32 %v2529_v3, %v1646_v15 }
0x2089   :  { %1650 = vrot.lane.b32.xlu1 %v1648_v16, %s2560_s3 }
0x20fb   :  { %v1651_v12 = vpop.permute.xlu1 %1650 }
0x20fc   :  { %2290 = vmatmul.mubr.msk.f32.vlgmr.msra.gmra.mrb[16].mxu1 %vm177_vm2, %v1651_v12 }
0x20fd   :  { %2418 = vmatpush3.bf16.msra.mxu1 %v2806_v59  ;;  %2311 = vmatprep.mubr.msk.f32.mxu1 %vm2557_vm1, %v2558_v4 }
0x20fe   :  { %2419 = vmatprep.subr.bf16.mxu1 %v2556_v0 }
0x2101   :  { %2421 = vmatpush3.bf16.msra.mxu1 %v2816_v2 }
0x21cf   :  { %v1720_v18 = vpop.f32.mrb[16].mxu1 }
0x21d0   :  { %v1724_v61 = vadd.f32 %v1720_v18, %v1141_v17  ;;  %v2291_v19 = vpop.f32.mrb[17].mxu1 }
0x21d2   :  { %2532 = vtanh.f32 %v1724_v61  ;;  %v1725_v63 = vsub.f32 0.0, %v1724_v61 }
0x21d4   :  { %v1726_v20 = vmul.f32 1.442695, %v1725_v63 }
0x21d6   :  { %2534 = vpow2.f32 %v1726_v20 }
0x21dc   :  { %v2533_v13 = vpop.eup %2532 }
0x21dd   :  { %1734 = vrot.lane.b32.xlu0 %v2533_v13, %s2559_s17 }
0x21e0   :  { %v2535_v59 = vpop.eup %2534 }
0x21e1   :  { %v1728_v21 = vadd.f32 1.0, %v2535_v59 }
0x21e3   :  { %2536 = vrcp.f32 %v1728_v21 }
0x21ed   :  { %v2537_v4 = vpop.eup %2536 }
0x21ee   :  { %v1732_v2 = vmul.f32 %v2537_v4, %v1642_v8 }
0x224f   :  { %v1735_v0 = vpop.permute.xlu0 %1734 }
0x2250   :  { %v1737_v22 = vmul.f32 %v2537_v4, %v1735_v0 }
0x2252   :  { %1739 = vrot.lane.b32.xlu1 %v1737_v22, %s2560_s3 }
0x22c4   :  { %v1740_v45 = vpop.permute.xlu1 %1739 }
0x22c5   :  { %v1742_v23 = vadd.f32 %v1740_v45, %v1732_v2 }
0x22c7   :  { %2538 = vtanh.f32 %v1742_v23 }
0x22d1   :  { %v2539_v24 = vpop.eup %2538 }
0x22d2   :  { %1745 = vrot.lane.b32.xlu0 %v2539_v24, %s2559_s17 }
0x2344   :  { %v1746_v44 = vpop.permute.xlu0 %1745 }
0x2345   :  { %v1748_v25 = vmul.f32 %v2537_v4, %v1746_v44 }
0x2347   :  { %1750 = vrot.lane.b32.xlu1 %v1748_v25, %s2560_s3 }
0x23b9   :  { %v1751_v26 = vpop.permute.xlu1 %1750 }
0x23ba   :  { %2301 = vmatmul.mubr.msk.f32.vlgmr.msra.gmra.mrb[26].mxu0 %vm177_vm2, %v1751_v26 }
0x248d   :  { %v1820_v28 = vpop.f32.mrb[26].mxu0 }
0x248e   :  { %v1824_v29 = vadd.f32 %v1820_v28, %v1146_v27  ;;  %v2302_v30 = vpop.f32.mrb[27].mxu0 }
0x2490   :  { %2540 = vtanh.f32 %v1824_v29  ;;  %v1825_v32 = vsub.f32 0.0, %v1824_v29 }
0x2492   :  { %v1826_v33 = vmul.f32 1.442695, %v1825_v32 }
0x2494   :  { %2542 = vpow2.f32 %v1826_v33 }
0x249a   :  { %v2541_v31 = vpop.eup %2540 }
0x249b   :  { %1834 = vrot.lane.b32.xlu0 %v2541_v31, %s2559_s17 }
0x249e   :  { %v2543_v34 = vpop.eup %2542 }
0x249f   :  { %v1828_v35 = vadd.f32 1.0, %v2543_v34 }
0x24a1   :  { %2544 = vrcp.f32 %v1828_v35 }
0x24ab   :  { %v2545_v36 = vpop.eup %2544 }
0x24ac   :  { %v1832_v39 = vmul.f32 %v2545_v36, %v1742_v23 }
0x250d   :  { %v1835_v37 = vpop.permute.xlu0 %1834 }
0x250e   :  { %v1837_v38 = vmul.f32 %v2545_v36, %v1835_v37 }
0x2510   :  { %1839 = vrot.lane.b32.xlu1 %v1837_v38, %s2560_s3 }
0x2582   :  { %v1840_v10 = vpop.permute.xlu1 %1839 }
0x2583   :  { %v1842_v43 = vadd.f32 %v1840_v10, %v1832_v39 }
0x2585   :  { %2546 = vtanh.f32 %v1842_v43 }
0x258f   :  { %v2547_v47 = vpop.eup %2546 }
0x2590   :  { %1845 = vrot.lane.b32.xlu0 %v2547_v47, %s2559_s17 }
0x2602   :  { %v1846_v1 = vpop.permute.xlu0 %1845 }
0x2603   :  { %v1848_v42 = vmul.f32 %v2545_v36, %v1846_v1 }
0x2605   :  { %1850 = vrot.lane.b32.xlu1 %v1848_v42, %s2560_s3 }
0x2677   :  { %v1851_v48 = vpop.permute.xlu1 %1850 }
0x2678   :  { %2312 = vmatmul.mubr.msk.f32.vlgmr.msra.gmra.mrb[18].mxu1 %vm177_vm2, %v1851_v48 }
0x274b   :  { %v1920_v50 = vpop.f32.mrb[18].mxu1 }
0x274c   :  { %v1924_v51 = vadd.f32 %v1920_v50, %v1151_v49  ;;  %v2313_v52 = vpop.f32.mrb[19].mxu1 }
0x274e   :  { %2548 = vtanh.f32 %v1924_v51  ;;  %v1925_v54 = vsub.f32 0.0, %v1924_v51 }
0x2750   :  { %v1926_v40 = vmul.f32 1.442695, %v1925_v54 }
0x2752   :  { %2550 = vpow2.f32 %v1926_v40 }
0x2758   :  { %v2549_v53 = vpop.eup %2548 }
0x2759   :  { %1934 = vrot.lane.b32.xlu0 %v2549_v53, %s2559_s17 }
0x275c   :  { %v2551_v55 = vpop.eup %2550 }
0x275d   :  { %v1928_v56 = vadd.f32 1.0, %v2551_v55 }
0x275f   :  { %2552 = vrcp.f32 %v1928_v56 }
0x2769   :  { %v2553_v57 = vpop.eup %2552 }
0x276a   :  { %v1932_v14 = vmul.f32 %v2553_v57, %v1842_v43 }
0x27cb   :  { %v1935_v58 = vpop.permute.xlu0 %1934 }
0x27cc   :  { %v1937_v60 = vmul.f32 %v2553_v57, %v1935_v58 }
0x27ce   :  { %1939 = vrot.lane.b32.xlu1 %v1937_v60, %s2560_s3 }
0x27d2   :  { %997 = vrot.lane.b32.xlu1 %v2857_v41, %s2561_s22 }
0x2840   :  { %v1940_v7 = vpop.permute.xlu1 %1939 }
0x2841   :  { %v1942_v62 = vadd.f32 %v1940_v7, %v1932_v14 }
0x2843   :  { %2554 = vtanh.f32 %v1942_v62  ;;  %1956 = vrot.lane.b32.xlu1 %v1942_v62, %s2561_s22 }
0x2844   :  { %v998_v3 = vpop.permute.xlu1 %997 }
0x2845   :  { %1981 = vst.msk [vmem:[%s2966_s7 + $0x10] sm:$0xff] %vm177_vm2, %v998_v3 }
0x284d   :  { %v2555_v5 = vpop.eup %2554 }
0x284e   :  { %1945 = vrot.lane.b32.xlu0 %v2555_v5, %s2559_s17 }
0x28b5   :  { %v1957_v6 = vpop.permute.xlu1 %1956 }
0x28b6   :  { %1999 = vst.msk [vmem:[%s2966_s7 + $0x18] sm:$0xff] %vm177_vm2, %v1957_v6 }
0x28c0   :  { %v1946_v41 = vpop.permute.xlu0 %1945 }
0x28c1   :  { %v1948_v9 = vmul.f32 %v2553_v57, %v1946_v41 }
0x28c3   :  { %1950 = vrot.lane.b32.xlu0 %v1948_v9, %s2560_s3 }
0x2935   :  { %v1951_v46 = vpop.permute.xlu0 %1950 }
0x2936   :  { %1998 = vst.msk [vmem:[%s2966_s7 + $0x8] sm:$0xff] %vm177_vm2, %v1951_v46 }

</bundles_post_ra>
